<compile_context>
chip_gen: v5e
topology: v5e:2x2
jax: 0.10.0
libtpu: 0.0.40
codegen_flags: <defaults>
</compile_context>

<pallas_src>
import jax
import jax.numpy as jnp
from jax.experimental import pallas as pl
from jax.experimental.pallas import tpu as pltpu

EMBED_DIM = 16          # hard-coded in the module (__init__ overwrites embed_dim)
TIME_STEPS = 61
PAD_CHANNELS = 1024


def pack_conv_weights(weight, bias, patch_size, image_width,
                      compute_dtype=jnp.bfloat16):
    """Precompute the per-channel block-diagonal projection weight (hoist once).

    Returns:
      w_packed: (C, ps*W, Wp*E) compute_dtype,
                w_packed[c, dy*W + wq*ps + dx, wp*E + e] = weight[e,c,dy,dx] * (wq==wp)
      b_packed: (1, Wp*E) float32, bias tiled over the Wp patch slots.
    """
    E, C, ps, ps2 = weight.shape
    assert ps == patch_size and ps2 == patch_size
    W = image_width
    assert W % ps == 0
    Wp = W // ps
    w_t = jnp.transpose(weight, (1, 2, 3, 0))            # (C, dy, dx, E)
    eye = jnp.eye(Wp, dtype=weight.dtype)
    # B[c, dy, wq, dx, wp, e] = w_t[c, dy, dx, e] * eye[wq, wp]
    w_packed = jnp.einsum('cyxe,qp->cyqxpe', w_t, eye)    # (C, ps, Wp, ps, Wp, E)
    w_packed = w_packed.reshape(C, ps * W, Wp * E).astype(compute_dtype)
    b_packed = jnp.tile(bias.astype(jnp.float32), Wp).reshape(1, Wp * E)
    return w_packed, b_packed


def _choose_image_tile(n_images, bytes_per_image, hp,
                       target_tile_bytes=8 * 1024 * 1024, min_steps=4):
    """Images per grid step + step count: >= min_steps (even) steps so the DMA
    pipelines and v7x's two TCs both get work; tiles ~target_tile_bytes so the
    ~0.35us per-step overhead is amortized (v6e tile sweep guidance)."""
    steps = max(min_steps, pl.cdiv(n_images * bytes_per_image, target_tile_bytes))
    steps = min(steps, n_images)
    if steps % 2 and steps < n_images:
        steps += 1                                   # even step count for dual-TC
    bn = pl.cdiv(n_images, steps)
    # Keep the output block sublane-aligned: (bn * Hp) % 8 == 0.
    while (bn * hp) % 8 and bn < n_images:
        bn += 1
    return bn, pl.cdiv(n_images, bn)


def temporal_patch_emb_forward(x, w_packed, b_packed, *, patch_size,
                               embed_dim=EMBED_DIM, time_steps=TIME_STEPS):
    """x: (N, C, H, W) float32 with N % time_steps == 0.
    w_packed/b_packed from pack_conv_weights.
    Returns (N // time_steps, 1024, Hp, Wp) float32."""
    N, C, H, W = x.shape
    ps = patch_size
    E = embed_dim
    if H % ps != 0 or W % ps != 0:
        raise ValueError("image dimensions must be divisible by the patch size")
    if N % time_steps != 0:
        raise ValueError("batch must be a multiple of time_steps")
    assert time_steps * E <= PAD_CHANNELS
    Hp, Wp = H // ps, W // ps
    KK = ps * W            # per-channel contraction length
    OO = Wp * E            # output width (lane-dense: 128 for Wp=8, E=16)
    assert w_packed.shape == (C, KK, OO), w_packed.shape
    assert b_packed.shape == (1, OO), b_packed.shape
    compute_dtype = w_packed.dtype

    bytes_per_image = C * H * W * x.dtype.itemsize
    bn, steps = _choose_image_tile(N, bytes_per_image, Hp)
    rows = bn * Hp

    def kernel(x_ref, w_ref, b_ref, o_ref):
        # x_ref: (bn, C, Hp, ps*W) f32 — one band of `bn` images, all channels.
        # w_ref: (C, ps*W, Wp*E) bf16 (VMEM-resident, constant index map).
        # b_ref: (1, Wp*E) f32.   o_ref: (bn*Hp, Wp*E) f32.
        xt = x_ref[...]
        acc = jnp.zeros((rows, OO), jnp.float32)
        for c in range(C):
            # Per-channel partial dot: (bn*Hp, ps*W) @ (ps*W, Wp*E) on the MXU,
            # f32 accumulation.  Slice/reshape touch only major dims (free).
            lhs = xt[:, c].reshape(rows, KK).astype(compute_dtype)
            acc = acc + jnp.dot(lhs, w_ref[c],
                                preferred_element_type=jnp.float32)
        o_ref[...] = acc + b_ref[...]

    # Free (row-major, no-transpose) reshape: row (n, c, hp) holds one ps-row
    # band of one channel -> the kernel needs no im2col relayout.
    x4 = x.reshape(N, C, Hp, KK)

    out = pl.pallas_call(
        kernel,
        out_shape=jax.ShapeDtypeStruct((N * Hp, OO), jnp.float32),
        grid_spec=pltpu.PrefetchScalarGridSpec(
            num_scalar_prefetch=0,
            grid=(steps,),
            in_specs=[
                pl.BlockSpec((bn, C, Hp, KK), lambda i: (i, 0, 0, 0)),
                pl.BlockSpec((C, KK, OO), lambda i: (0, 0, 0)),   # DMA'd once
                pl.BlockSpec((1, OO), lambda i: (0, 0)),
            ],
            out_specs=pl.BlockSpec((rows, OO), lambda i: (i, 0)),
        ),
        compiler_params=pltpu.CompilerParams(
            dimension_semantics=("parallel",),
            vmem_limit_bytes=48 * 1024 * 1024,     # safe on v7x (64 MiB VMEM)
        ),
        cost_estimate=pl.CostEstimate(
            # Actual executed MXU work (block-diagonal fold => Wp x logical flops).
            flops=2 * N * Hp * C * KK * OO,
            transcendentals=0,
            bytes_accessed=(N * C * H * W * x.dtype.itemsize
                            + C * KK * OO * w_packed.dtype.itemsize
                            + OO * 4
                            + N * Hp * OO * 4),
        ),
    )(x4, w_packed, b_packed)

    # (N*Hp, Wp*E) is row-major identical to (N, Hp, Wp, E).
    y = out.reshape(N, Hp, Wp, E).transpose(0, 3, 1, 2)          # (N, E, Hp, Wp)
    B = N // time_steps
    y = y.reshape(B, time_steps * E, Hp, Wp)                     # torch .view
    # F.pad(..., (0,0, 0,0, 0, 1024 - 61*E, 0,0)): zero-pad channels to 1024.
    y = jnp.pad(y, ((0, 0), (0, PAD_CHANNELS - time_steps * E), (0, 0), (0, 0)))
    return y


def _reference_forward(x, weight, bias, patch_size, time_steps=TIME_STEPS):
    """Pure-JAX reference (lax conv) matching the PyTorch module semantics."""
    y = jax.lax.conv_general_dilated(
        x, weight,
        window_strides=(patch_size, patch_size),
        padding="VALID",
        dimension_numbers=("NCHW", "OIHW", "NCHW"),
        precision=jax.lax.Precision.HIGHEST,
    ) + bias.reshape(1, -1, 1, 1)
    B = x.shape[0] // time_steps
    y = y.reshape(B, time_steps * weight.shape[0], y.shape[2], y.shape[3])
    return jnp.pad(
        y, ((0, 0), (0, PAD_CHANNELS - time_steps * weight.shape[0]), (0, 0), (0, 0))
    )


if __name__ == "__main__":
    # Small shapes consistent with the module: one temporal group of 61 frames,
    # channels=4, image 64x64, patch 8 -> 8x8 patch grid, embed_dim=16.
    image_size = (64, 64)
    patch_size = 8
    channels = 4
    batch_groups = 1
    N = batch_groups * TIME_STEPS

    key = jax.random.PRNGKey(0)
    kx, kw, kb = jax.random.split(key, 3)
    x = jax.random.normal(kx, (N, channels, *image_size), dtype=jnp.float32)
    weight = 0.02 * jax.random.normal(
        kw, (EMBED_DIM, channels, patch_size, patch_size), dtype=jnp.float32)
    bias = 0.02 * jax.random.normal(kb, (EMBED_DIM,), dtype=jnp.float32)

    # Hoisted out of the per-call path: packed once, reused every forward call.
    w_packed, b_packed = jax.block_until_ready(
        pack_conv_weights(weight, bias, patch_size, image_size[1]))

    fwd = jax.jit(lambda xx, wp, bp: temporal_patch_emb_forward(
        xx, wp, bp, patch_size=patch_size))
    out = jax.block_until_ready(fwd(x, w_packed, b_packed))

    Hp, Wp = image_size[0] // patch_size, image_size[1] // patch_size
    assert out.shape == (batch_groups, PAD_CHANNELS, Hp, Wp), out.shape

    # Tight check vs. a reference fed the same bf16-rounded inputs (isolates
    # the deliberate bf16-multiply approximation from kernel correctness).
    xq = x.astype(jnp.bfloat16).astype(jnp.float32)
    wq = weight.astype(jnp.bfloat16).astype(jnp.float32)
    ref_matched = _reference_forward(xq, wq, bias, patch_size)
    assert jnp.allclose(out, ref_matched, atol=2e-3, rtol=2e-3), float(
        jnp.max(jnp.abs(out - ref_matched)))

    # Loose check vs. the exact f32 module semantics (bf16 rounding only).
    ref_f32 = _reference_forward(x, weight, bias, patch_size)
    assert jnp.allclose(out, ref_f32, atol=2e-2, rtol=2e-2), float(
        jnp.max(jnp.abs(out - ref_f32)))

    print("KERNEL_OK")
</pallas_src>

<mosaic_0001>
module attributes {stable_mosaic.version = 11 : i64} {
  func.func @kernel(%arg0: i32, %arg1: memref<16x4x8x512xf32, #tpu.memory_space<vmem>>, %arg2: memref<4x512x128xbf16, #tpu.memory_space<vmem>>, %arg3: memref<1x128xf32, #tpu.memory_space<vmem>>, %arg4: memref<128x128xf32, #tpu.memory_space<vmem>>) attributes {dimension_semantics = [#tpu.dimension_semantics<parallel>], iteration_bounds = array<i64: 4>, scalar_prefetch = 0 : i64, scratch_operands = 0 : i64, tpu.core_type = #tpu.core_type<tc>, window_params = [{transform_indices = @transform_0, window_bounds = array<i64: 16, 4, 8, 512>}, {pipeline_mode = #tpu.pipeline_mode<synchronous>, transform_indices = @transform_1, window_bounds = array<i64: 4, 512, 128>}, {pipeline_mode = #tpu.pipeline_mode<synchronous>, transform_indices = @transform_2, window_bounds = array<i64: 1, 128>}, {transform_indices = @transform_3, window_bounds = array<i64: 128, 128>}]} {
    %c0 = arith.constant 0 : index
    %c0_0 = arith.constant 0 : index
    %c0_1 = arith.constant 0 : index
    %c0_2 = arith.constant 0 : index
    %0 = vector.load %arg1[%c0, %c0_0, %c0_1, %c0_2] : memref<16x4x8x512xf32, #tpu.memory_space<vmem>>, vector<16x4x8x512xf32>
    %cst = arith.constant 0.000000e+00 : f32
    %1 = vector.broadcast %cst : f32 to vector<128x128xf32>
    %2 = vector.extract_strided_slice %0 {offsets = [0, 0, 0, 0], sizes = [16, 1, 8, 512], strides = [1, 1, 1, 1]} : vector<16x4x8x512xf32> to vector<16x1x8x512xf32>
    %3 = vector.shape_cast %2 : vector<16x1x8x512xf32> to vector<16x8x512xf32>
    %4 = vector.shape_cast %3 : vector<16x8x512xf32> to vector<128x512xf32>
    %5 = arith.truncf %4 : vector<128x512xf32> to vector<128x512xbf16>
    %c0_3 = arith.constant 0 : index
    %c0_4 = arith.constant 0 : index
    %c0_5 = arith.constant 0 : index
    %6 = vector.load %arg2[%c0_3, %c0_4, %c0_5] : memref<4x512x128xbf16, #tpu.memory_space<vmem>>, vector<1x512x128xbf16>
    %7 = vector.shape_cast %6 : vector<1x512x128xbf16> to vector<512x128xbf16>
    %cst_6 = arith.constant dense<0.000000e+00> : vector<128x128xf32>
    %8 = tpu.matmul %5, %7, %cst_6 {dimension_numbers = #tpu.dot_dimension_numbers<[1], [0], [0], [1], [0, 0, 1, 1], [], []>} : vector<128x512xbf16>, vector<512x128xbf16>, vector<128x128xf32> -> vector<128x128xf32>
    %9 = arith.addf %1, %8 : vector<128x128xf32>
    %10 = vector.extract_strided_slice %0 {offsets = [0, 1, 0, 0], sizes = [16, 1, 8, 512], strides = [1, 1, 1, 1]} : vector<16x4x8x512xf32> to vector<16x1x8x512xf32>
    %11 = vector.shape_cast %10 : vector<16x1x8x512xf32> to vector<16x8x512xf32>
    %12 = vector.shape_cast %11 : vector<16x8x512xf32> to vector<128x512xf32>
    %13 = arith.truncf %12 : vector<128x512xf32> to vector<128x512xbf16>
    %c1 = arith.constant 1 : index
    %c0_7 = arith.constant 0 : index
    %c0_8 = arith.constant 0 : index
    %14 = vector.load %arg2[%c1, %c0_7, %c0_8] : memref<4x512x128xbf16, #tpu.memory_space<vmem>>, vector<1x512x128xbf16>
    %15 = vector.shape_cast %14 : vector<1x512x128xbf16> to vector<512x128xbf16>
    %cst_9 = arith.constant dense<0.000000e+00> : vector<128x128xf32>
    %16 = tpu.matmul %13, %15, %cst_9 {dimension_numbers = #tpu.dot_dimension_numbers<[1], [0], [0], [1], [0, 0, 1, 1], [], []>} : vector<128x512xbf16>, vector<512x128xbf16>, vector<128x128xf32> -> vector<128x128xf32>
    %17 = arith.addf %9, %16 : vector<128x128xf32>
    %18 = vector.extract_strided_slice %0 {offsets = [0, 2, 0, 0], sizes = [16, 1, 8, 512], strides = [1, 1, 1, 1]} : vector<16x4x8x512xf32> to vector<16x1x8x512xf32>
    %19 = vector.shape_cast %18 : vector<16x1x8x512xf32> to vector<16x8x512xf32>
    %20 = vector.shape_cast %19 : vector<16x8x512xf32> to vector<128x512xf32>
    %21 = arith.truncf %20 : vector<128x512xf32> to vector<128x512xbf16>
    %c2 = arith.constant 2 : index
    %c0_10 = arith.constant 0 : index
    %c0_11 = arith.constant 0 : index
    %22 = vector.load %arg2[%c2, %c0_10, %c0_11] : memref<4x512x128xbf16, #tpu.memory_space<vmem>>, vector<1x512x128xbf16>
    %23 = vector.shape_cast %22 : vector<1x512x128xbf16> to vector<512x128xbf16>
    %cst_12 = arith.constant dense<0.000000e+00> : vector<128x128xf32>
    %24 = tpu.matmul %21, %23, %cst_12 {dimension_numbers = #tpu.dot_dimension_numbers<[1], [0], [0], [1], [0, 0, 1, 1], [], []>} : vector<128x512xbf16>, vector<512x128xbf16>, vector<128x128xf32> -> vector<128x128xf32>
    %25 = arith.addf %17, %24 : vector<128x128xf32>
    %26 = vector.extract_strided_slice %0 {offsets = [0, 3, 0, 0], sizes = [16, 1, 8, 512], strides = [1, 1, 1, 1]} : vector<16x4x8x512xf32> to vector<16x1x8x512xf32>
    %27 = vector.shape_cast %26 : vector<16x1x8x512xf32> to vector<16x8x512xf32>
    %28 = vector.shape_cast %27 : vector<16x8x512xf32> to vector<128x512xf32>
    %29 = arith.truncf %28 : vector<128x512xf32> to vector<128x512xbf16>
    %c3 = arith.constant 3 : index
    %c0_13 = arith.constant 0 : index
    %c0_14 = arith.constant 0 : index
    %30 = vector.load %arg2[%c3, %c0_13, %c0_14] : memref<4x512x128xbf16, #tpu.memory_space<vmem>>, vector<1x512x128xbf16>
    %31 = vector.shape_cast %30 : vector<1x512x128xbf16> to vector<512x128xbf16>
    %cst_15 = arith.constant dense<0.000000e+00> : vector<128x128xf32>
    %32 = tpu.matmul %29, %31, %cst_15 {dimension_numbers = #tpu.dot_dimension_numbers<[1], [0], [0], [1], [0, 0, 1, 1], [], []>} : vector<128x512xbf16>, vector<512x128xbf16>, vector<128x128xf32> -> vector<128x128xf32>
    %33 = arith.addf %25, %32 : vector<128x128xf32>
    %c0_16 = arith.constant 0 : index
    %c0_17 = arith.constant 0 : index
    %34 = vector.load %arg3[%c0_16, %c0_17] : memref<1x128xf32, #tpu.memory_space<vmem>>, vector<1x128xf32>
    %35 = vector.broadcast %34 : vector<1x128xf32> to vector<128x128xf32>
    %36 = arith.addf %33, %35 : vector<128x128xf32>
    %c0_18 = arith.constant 0 : index
    %c0_19 = arith.constant 0 : index
    %37 = vector.load %arg4[%c0_18, %c0_19] : memref<128x128xf32, #tpu.memory_space<vmem>>, vector<128x128xf32>
    tpu.vector_store %arg4[%c0_18, %c0_19], %36 {strides = array<i32>} : memref<128x128xf32, #tpu.memory_space<vmem>>, vector<128x128xf32>,
    return
  }
  func.func @transform_0(%arg0: i32) -> (i32, i32, i32, i32) {
    %c0_i32 = arith.constant 0 : i32
    %c0_i32_0 = arith.constant 0 : i32
    %c0_i32_1 = arith.constant 0 : i32
    %c0_i32_2 = arith.constant 0 : i32
    return %arg0, %c0_i32, %c0_i32_0, %c0_i32_1 : i32, i32, i32, i32
  }
  func.func @transform_1(%arg0: i32) -> (i32, i32, i32) {
    %c0_i32 = arith.constant 0 : i32
    %c0_i32_0 = arith.constant 0 : i32
    %c0_i32_1 = arith.constant 0 : i32
    %c0_i32_2 = arith.constant 0 : i32
    return %c0_i32, %c0_i32_0, %c0_i32_1 : i32, i32, i32
  }
  func.func @transform_2(%arg0: i32) -> (i32, i32) {
    %c0_i32 = arith.constant 0 : i32
    %c0_i32_0 = arith.constant 0 : i32
    %c0_i32_1 = arith.constant 0 : i32
    return %c0_i32, %c0_i32_0 : i32, i32
  }
  func.func @transform_3(%arg0: i32) -> (i32, i32) {
    %c0_i32 = arith.constant 0 : i32
    %c0_i32_0 = arith.constant 0 : i32
    return %arg0, %c0_i32 : i32, i32
  }
}

</mosaic_0001>

<bundles_post_ra>
// kernel: _lambda_.1
= control target key start
LH: loop header
LB: loop body
LE: loop exit
PB: predicated region body
PF: predicated region fallthrough
CT: control target
= control target key end

     0   :  { %s3802_s12 = smov 0   ;;  %s3804_s13 = smov 0   ;;  %s4769_s0 = inlined_call_operand.vmem [shape: f32[61,4,8,512], index: 0, kind: input, shape index: {}]   ;;  %s4770_s1 = inlined_call_operand.vmem [shape: bf16[4,512,128], index: 1, kind: input, shape index: {}]   ;;  %s4771_s2 = inlined_call_operand.vmem [shape: f32[1,128], index: 2, kind: input, shape index: {}]   ;;  %s4772_s3 = inlined_call_operand.vmem [shape: f32[488,128], index: 3, kind: output, shape index: {}]  }
   0x1   :  { %s3806_s14 = smov 0  }
   0x2 LB: > { %s3815_s15 = sadd.s32 4294967295, %s3748_s14   ;;  %s3817_s16 = sadd.s32 1, %s3748_s14   ;;  %s3748_s14 = sphi %s3806_s14, %s4781_s14   ;;  %s3744_s13 = sphi %s3804_s13, %s4780_s13   ;;  %s3740_s12 = sphi %s3802_s12, %s4779_s12  }
   0x3   : > { %s85_s17 = ssub.s32 %s3748_s14, %s3817_s16  ;;  %s88_s18 = sadd.s32 1, %s3744_s13 }
   0x4   : > { %p86_p0 = scmp.eq.s32.totalorder %s85_s17, 0  ;;  %p98_p1 = scmp.ne.s32.totalorder %s3744_s13, %s3740_s12 }
   0x5   : > { %p99_p2 = scmp.eq.s32.totalorder %s3815_s15, 3  ;;  %p2747_p3 = scmp.ge.s32.totalorder %s3748_s14, 1 }
   0x6   : > { %s3825_s19 = scalar_select %p86_p0, %s3744_s13, %s88_s18  }
   0x7   : > { %p3827_p4 = por %p99_p2, %p98_p1  ;;  %p151_p5 = scmp.lt.s32.totalorder %s3748_s14, 5 }
   0x9   : > { %p152_p6 = pnand %p2747_p3, %p151_p5 }
   0xa   : > { %s3868_s24 = sshll.u32 (!%p152_p6), %s3815_s15, 4 }
   0xb   : > { %155 = sbr.rel (%p152_p6) target bundleno = 743 (0x2e7), region = 32  ;;  %p188_p7 = scmp.lt.s32.totalorder (!%p152_p6), %s3868_s24, 60 }
  0x10   : > { %v3513_v0 = vld [vmem:[%s4770_s1 + $0x138] sm:$0xff]  ;;  %v3512_v4 = vld [vmem:[%s4770_s1 + $0x130] sm:$0xff]  ;;  %v3511_v8 = vld [vmem:[%s4770_s1 + $0x128] sm:$0xff]  ;;  %s189_s18 = scalar_select %p188_p7, %s3868_s24, 60 }
  0x11   : > { %v3521_v1 = vld [vmem:[%s4770_s1 + $0x178] sm:$0xff]  ;;  %846 = vmatpush.bf16.msra.mxu0 %v3513_v0  ;;  %v3520_v5 = vld [vmem:[%s4770_s1 + $0x170] sm:$0xff]  ;;  %v3519_v9 = vld [vmem:[%s4770_s1 + $0x168] sm:$0xff]  ;;  %s3602_s9 = sshll.u32 (%p3827_p4), %s3815_s15, 7 }
  0x12   : > { %v3529_v2 = vld [vmem:[%s4770_s1 + $0x1b8] sm:$0xff]  ;;  %895 = vmatpush.bf16.msra.mxu1 %v3521_v1  ;;  %v3528_v6 = vld [vmem:[%s4770_s1 + $0x1b0] sm:$0xff]  ;;  %v3527_v10 = vld [vmem:[%s4770_s1 + $0x1a8] sm:$0xff]  ;;  %s3473_s30 = sshll.u32 %s189_s18, 7  ;;  %s4672_s17 = scalar_lea.vmem (%p3827_p4), %s4772_s3, %s3602_s9  }
  0x13   : > { %v3537_v3 = vld [vmem:[%s4770_s1 + $0x1f8] sm:$0xff]  ;;  %944 = vmatpush.bf16.msra.mxu2 %v3529_v2  ;;  %v3536_v7 = vld [vmem:[%s4770_s1 + $0x1f0] sm:$0xff]  ;;  %v3535_v11 = vld [vmem:[%s4770_s1 + $0x1e8] sm:$0xff]  ;;  %s3917_s10 = scalar_lea.vmem %s4769_s0, %s3473_s30 }
  0x14   : > { %993 = vmatpush.bf16.msra.mxu3 %v3537_v3  ;;  %v3510_v12 = vld [vmem:[%s4770_s1 + $0x120] sm:$0xff]  ;;  %v3509_v16 = vld [vmem:[%s4770_s1 + $0x118] sm:$0xff]  ;;  %v3508_v20 = vld [vmem:[%s4770_s1 + $0x110] sm:$0xff] }
  0x15   : > { %847 = vmatpush.bf16.msra.mxu0 %v3512_v4  ;;  %v3518_v13 = vld [vmem:[%s4770_s1 + $0x160] sm:$0xff]  ;;  %v3517_v17 = vld [vmem:[%s4770_s1 + $0x158] sm:$0xff]  ;;  %v3516_v21 = vld [vmem:[%s4770_s1 + $0x150] sm:$0xff] }
  0x16   : > { %896 = vmatpush.bf16.msra.mxu1 %v3520_v5  ;;  %v3526_v14 = vld [vmem:[%s4770_s1 + $0x1a0] sm:$0xff]  ;;  %v3525_v18 = vld [vmem:[%s4770_s1 + $0x198] sm:$0xff]  ;;  %v3524_v22 = vld [vmem:[%s4770_s1 + $0x190] sm:$0xff] }
  0x17   : > { %945 = vmatpush.bf16.msra.mxu2 %v3528_v6  ;;  %v3534_v15 = vld [vmem:[%s4770_s1 + $0x1e0] sm:$0xff]  ;;  %v3533_v19 = vld [vmem:[%s4770_s1 + $0x1d8] sm:$0xff]  ;;  %v3532_v23 = vld [vmem:[%s4770_s1 + $0x1d0] sm:$0xff] }
  0x18   : > { %994 = vmatpush.bf16.msra.mxu3 %v3536_v7  ;;  %v3507_v24 = vld [vmem:[%s4770_s1 + $0x108] sm:$0xff]  ;;  %v3506_v28 = vld [vmem:[%s4770_s1 + $0x100] sm:$0xff]  ;;  %v211_v36 = vld [vmem:[%s3917_s10 + $0x30] sm:$0xff] }
  0x19   : > { %848 = vmatpush.bf16.msra.mxu0 %v3511_v8  ;;  %v3515_v25 = vld [vmem:[%s4770_s1 + $0x148] sm:$0xff]  ;;  %v3514_v29 = vld [vmem:[%s4770_s1 + $0x140] sm:$0xff]  ;;  %v227_v37 = vld [vmem:[%s3917_s10 + $0xb0] sm:$0xff] }
  0x1a   : > { %897 = vmatpush.bf16.msra.mxu1 %v3519_v9  ;;  %v3523_v26 = vld [vmem:[%s4770_s1 + $0x188] sm:$0xff]  ;;  %v3522_v30 = vld [vmem:[%s4770_s1 + $0x180] sm:$0xff]  ;;  %v212_v38 = vld [vmem:[%s3917_s10 + $0x38] sm:$0xff]  ;;  %v559_v44 = vpack.c.bf16 %v227_v37, %v211_v36 }
  0x1b   : > { %946 = vmatpush.bf16.msra.mxu2 %v3527_v10  ;;  %v3531_v27 = vld [vmem:[%s4770_s1 + $0x1c8] sm:$0xff]  ;;  %v3530_v31 = vld [vmem:[%s4770_s1 + $0x1c0] sm:$0xff]  ;;  %v228_v39 = vld [vmem:[%s3917_s10 + $0xb8] sm:$0xff] }
  0x1c   : > { %995 = vmatpush.bf16.msra.mxu3 %v3535_v11  ;;  %v209_v32 = vld [vmem:[%s3917_s10 + $0x20] sm:$0xff]  ;;  %v210_v34 = vld [vmem:[%s3917_s10 + $0x28] sm:$0xff]  ;;  %v3497_v40 = vld [vmem:[%s4770_s1 + $0xb8] sm:$0xff]  ;;  %v560_v45 = vpack.c.bf16 %v228_v39, %v212_v38 }
  0x1d   : > { %849 = vmatpush.bf16.msra.mxu0 %v3510_v12  ;;  %v225_v33 = vld [vmem:[%s3917_s10 + $0xa0] sm:$0xff]  ;;  %v226_v35 = vld [vmem:[%s3917_s10 + $0xa8] sm:$0xff]  ;;  %v3505_v41 = vld [vmem:[%s4770_s1 + $0xf8] sm:$0xff] }
  0x1e   : > { %898 = vmatpush.bf16.msra.mxu1 %v3518_v13  ;;  %v557_v42 = vpack.c.bf16 %v225_v33, %v209_v32  ;;  %v558_v43 = vpack.c.bf16 %v226_v35, %v210_v34  ;;  %v3481_v46 = vld [vmem:[%s4770_s1 + $0x38] sm:$0xff]  ;;  %v3496_v48 = vld [vmem:[%s4770_s1 + $0xb0] sm:$0xff]  ;;  %v3495_v52 = vld [vmem:[%s4770_s1 + $0xa8] sm:$0xff] }
  0x1f   : > { %947 = vmatpush.bf16.msra.mxu2 %v3526_v14  ;;  %v3489_v47 = vld [vmem:[%s4770_s1 + $0x78] sm:$0xff]  ;;  %v3504_v49 = vld [vmem:[%s4770_s1 + $0xf0] sm:$0xff]  ;;  %v3503_v53 = vld [vmem:[%s4770_s1 + $0xe8] sm:$0xff] }
  0x20   : > { %996 = vmatpush.bf16.msra.mxu3 %v3534_v15  ;;  %v3480_v50 = vld [vmem:[%s4770_s1 + $0x30] sm:$0xff]  ;;  %v3479_v54 = vld [vmem:[%s4770_s1 + $0x28] sm:$0xff]  ;;  %v241_v56 = vld [vmem:[%s3917_s10 + $0x120] sm:$0xff] }
  0x21   : > { %850 = vmatpush.bf16.msra.mxu0 %v3509_v16  ;;  %v3488_v51 = vld [vmem:[%s4770_s1 + $0x70] sm:$0xff]  ;;  %v3487_v55 = vld [vmem:[%s4770_s1 + $0x68] sm:$0xff]  ;;  %v257_v57 = vld [vmem:[%s3917_s10 + $0x1a0] sm:$0xff] }
  0x22   : > { %899 = vmatpush.bf16.msra.mxu1 %v3517_v17  ;;  %v242_v58 = vld [vmem:[%s3917_s10 + $0x128] sm:$0xff]  ;;  %v243_v60 = vld [vmem:[%s3917_s10 + $0x130] sm:$0xff]  ;;  %v244_v62 = vld [vmem:[%s3917_s10 + $0x138] sm:$0xff]  ;;  %v561_v0 = vpack.c.bf16 %v257_v57, %v241_v56 }
  0x23   : > { %948 = vmatpush.bf16.msra.mxu2 %v3525_v18  ;;  %v258_v59 = vld [vmem:[%s3917_s10 + $0x1a8] sm:$0xff]  ;;  %v259_v61 = vld [vmem:[%s3917_s10 + $0x1b0] sm:$0xff]  ;;  %v260_v63 = vld [vmem:[%s3917_s10 + $0x1b8] sm:$0xff] }
  0x24   : > { %997 = vmatpush.bf16.msra.mxu3 %v3533_v19  ;;  %v562_v1 = vpack.c.bf16 %v258_v59, %v242_v58  ;;  %v563_v2 = vpack.c.bf16 %v259_v61, %v243_v60  ;;  %v564_v3 = vpack.c.bf16 %v260_v63, %v244_v62  ;;  %v3494_v4 = vld [vmem:[%s4770_s1 + $0xa0] sm:$0xff]  ;;  %v274_v10 = vld [vmem:[%s3917_s10 + $0x228] sm:$0xff]  ;;  %v275_v12 = vld [vmem:[%s3917_s10 + $0x230] sm:$0xff] }
  0x25   : > { %851 = vmatpush.bf16.msra.mxu0 %v3508_v20  ;;  %v3502_v5 = vld [vmem:[%s4770_s1 + $0xe0] sm:$0xff]  ;;  %v290_v11 = vld [vmem:[%s3917_s10 + $0x2a8] sm:$0xff]  ;;  %v291_v13 = vld [vmem:[%s3917_s10 + $0x2b0] sm:$0xff] }
  0x26   : > { %900 = vmatpush.bf16.msra.mxu1 %v3516_v21  ;;  %v3478_v6 = vld [vmem:[%s4770_s1 + $0x20] sm:$0xff]  ;;  %v276_v14 = vld [vmem:[%s3917_s10 + $0x238] sm:$0xff]  ;;  %v566_v17 = vpack.c.bf16 %v290_v11, %v274_v10  ;;  %v567_v18 = vpack.c.bf16 %v291_v13, %v275_v12  ;;  %v3492_v36 = vld [vmem:[%s4770_s1 + $0x90] sm:$0xff] }
  0x27   : > { %949 = vmatpush.bf16.msra.mxu2 %v3524_v22  ;;  %v3486_v7 = vld [vmem:[%s4770_s1 + $0x60] sm:$0xff]  ;;  %v292_v15 = vld [vmem:[%s3917_s10 + $0x2b8] sm:$0xff]  ;;  %v3500_v37 = vld [vmem:[%s4770_s1 + $0xd0] sm:$0xff] }
  0x28   : > { %998 = vmatpush.bf16.msra.mxu3 %v3532_v23  ;;  %v273_v8 = vld [vmem:[%s3917_s10 + $0x220] sm:$0xff]  ;;  %v568_v19 = vpack.c.bf16 %v292_v15, %v276_v14  ;;  %v3493_v20 = vld [vmem:[%s4770_s1 + $0x98] sm:$0xff]  ;;  %v3476_v38 = vld [vmem:[%s4770_s1 + $0x10] sm:$0xff] }
  0x29   : > { %852 = vmatpush.bf16.msra.mxu0 %v3507_v24  ;;  %v289_v9 = vld [vmem:[%s3917_s10 + $0x2a0] sm:$0xff]  ;;  %v3501_v21 = vld [vmem:[%s4770_s1 + $0xd8] sm:$0xff]  ;;  %v3484_v39 = vld [vmem:[%s4770_s1 + $0x50] sm:$0xff] }
  0x2a   : > { %901 = vmatpush.bf16.msra.mxu1 %v3515_v25  ;;  %v565_v16 = vpack.c.bf16 %v289_v9, %v273_v8  ;;  %v3477_v22 = vld [vmem:[%s4770_s1 + $0x18] sm:$0xff]  ;;  %v305_v24 = vld [vmem:[%s3917_s10 + $0x320] sm:$0xff]  ;;  %v370_v58 = vld [vmem:[%s3917_s10 + $0x528] sm:$0xff] }
  0x2b   : > { %950 = vmatpush.bf16.msra.mxu2 %v3523_v26  ;;  %v3485_v23 = vld [vmem:[%s4770_s1 + $0x58] sm:$0xff]  ;;  %v321_v25 = vld [vmem:[%s3917_s10 + $0x3a0] sm:$0xff]  ;;  %v306_v26 = vld [vmem:[%s3917_s10 + $0x328] sm:$0xff] }
  0x2c   : > { %999 = vmatpush.bf16.msra.mxu3 %v3531_v27  ;;  %v322_v27 = vld [vmem:[%s3917_s10 + $0x3a8] sm:$0xff]  ;;  %v569_v32 = vpack.c.bf16 %v321_v25, %v305_v24  ;;  %v369_v56 = vld [vmem:[%s3917_s10 + $0x520] sm:$0xff]  ;;  %v371_v60 = vld [vmem:[%s3917_s10 + $0x530] sm:$0xff] }
  0x2d   : > { %853 = vmatpush.bf16.msra.mxu0 %v3506_v28  ;;  %v307_v28 = vld [vmem:[%s3917_s10 + $0x330] sm:$0xff]  ;;  %v570_v33 = vpack.c.bf16 %v322_v27, %v306_v26  ;;  %v385_v57 = vld [vmem:[%s3917_s10 + $0x5a0] sm:$0xff]  ;;  %v386_v59 = vld [vmem:[%s3917_s10 + $0x5a8] sm:$0xff] }
  0x2e   : > { %902 = vmatpush.bf16.msra.mxu1 %v3514_v29  ;;  %v323_v29 = vld [vmem:[%s3917_s10 + $0x3b0] sm:$0xff]  ;;  %v372_v62 = vld [vmem:[%s3917_s10 + $0x538] sm:$0xff]  ;;  %v401_v8 = vld [vmem:[%s3917_s10 + $0x620] sm:$0xff] }
  0x2f   : > { %951 = vmatpush.bf16.msra.mxu2 %v3522_v30  ;;  %v308_v30 = vld [vmem:[%s3917_s10 + $0x338] sm:$0xff]  ;;  %v571_v34 = vpack.c.bf16 %v323_v29, %v307_v28  ;;  %v387_v61 = vld [vmem:[%s3917_s10 + $0x5b0] sm:$0xff]  ;;  %v417_v9 = vld [vmem:[%s3917_s10 + $0x6a0] sm:$0xff] }
  0x30   : > { %1000 = vmatpush.bf16.msra.mxu3 %v3530_v31  ;;  %854 = vmatmul.bf16.vlgmr.msra.gmra.mxu0 %v557_v42  ;;  %v324_v31 = vld [vmem:[%s3917_s10 + $0x3b8] sm:$0xff]  ;;  %v338_v42 = vld [vmem:[%s3917_s10 + $0x428] sm:$0xff]  ;;  %v403_v12 = vld [vmem:[%s3917_s10 + $0x630] sm:$0xff] }
  0x31   : > { %903 = vmatmul.bf16.vlgmr.msra.gmra.mxu1 %v558_v43  ;;  %1234 = vmatpush.bf16.msrb.mxu0 %v3481_v46  ;;  %v572_v35 = vpack.c.bf16 %v324_v31, %v308_v30  ;;  %v354_v43 = vld [vmem:[%s3917_s10 + $0x4a8] sm:$0xff]  ;;  %v340_v46 = vld [vmem:[%s3917_s10 + $0x438] sm:$0xff]  ;;  %v419_v13 = vld [vmem:[%s3917_s10 + $0x6b0] sm:$0xff] }
  0x32   : > { %952 = vmatmul.bf16.vlgmr.msra.gmra.mxu2 %v559_v44  ;;  %1283 = vmatpush.bf16.msrb.mxu1 %v3489_v47  ;;  %v339_v44 = vld [vmem:[%s3917_s10 + $0x430] sm:$0xff]  ;;  %v356_v47 = vld [vmem:[%s3917_s10 + $0x4b8] sm:$0xff]  ;;  %v402_v10 = vld [vmem:[%s3917_s10 + $0x628] sm:$0xff] }
  0x33   : > { %1332 = vmatpush.bf16.msrb.mxu2 %v3497_v40  ;;  %1001 = vmatmul.bf16.vlgmr.msra.gmra.mxu3 %v560_v45  ;;  %v337_v40 = vld [vmem:[%s3917_s10 + $0x420] sm:$0xff]  ;;  %v355_v45 = vld [vmem:[%s3917_s10 + $0x4b0] sm:$0xff]  ;;  %v388_v63 = vld [vmem:[%s3917_s10 + $0x5b8] sm:$0xff] }
  0x34   : > { %1381 = vmatpush.bf16.msrb.mxu3 %v3505_v41  ;;  %v353_v41 = vld [vmem:[%s3917_s10 + $0x4a0] sm:$0xff]  ;;  %v418_v11 = vld [vmem:[%s3917_s10 + $0x6a8] sm:$0xff]  ;;  %v404_v14 = vld [vmem:[%s3917_s10 + $0x638] sm:$0xff] }
  0x35   : > { %1235 = vmatpush.bf16.msrb.mxu0 %v3480_v50  ;;  %v575_v50 = vpack.c.bf16 %v355_v45, %v339_v44  ;;  %v420_v15 = vld [vmem:[%s3917_s10 + $0x6b8] sm:$0xff]  ;;  %v433_v24 = vld [vmem:[%s3917_s10 + $0x720] sm:$0xff]  ;;  %v434_v26 = vld [vmem:[%s3917_s10 + $0x728] sm:$0xff] }
  0x36   : > { %1284 = vmatpush.bf16.msrb.mxu1 %v3488_v51  ;;  %v576_v51 = vpack.c.bf16 %v356_v47, %v340_v46  ;;  %v449_v25 = vld [vmem:[%s3917_s10 + $0x7a0] sm:$0xff]  ;;  %v450_v27 = vld [vmem:[%s3917_s10 + $0x7a8] sm:$0xff]  ;;  %v435_v28 = vld [vmem:[%s3917_s10 + $0x730] sm:$0xff] }
  0x37   : > { %1333 = vmatpush.bf16.msrb.mxu2 %v3496_v48  ;;  %v573_v48 = vpack.c.bf16 %v353_v41, %v337_v40  ;;  %v451_v29 = vld [vmem:[%s3917_s10 + $0x7b0] sm:$0xff]  ;;  %v436_v30 = vld [vmem:[%s3917_s10 + $0x738] sm:$0xff]  ;;  %v205_v40 = vld [vmem:[%s3917_s10] sm:$0xff] }
  0x38   : > { %1382 = vmatpush.bf16.msrb.mxu3 %v3504_v49  ;;  %v574_v49 = vpack.c.bf16 %v354_v43, %v338_v42  ;;  %v452_v31 = vld [vmem:[%s3917_s10 + $0x7b8] sm:$0xff]  ;;  %v221_v41 = vld [vmem:[%s3917_s10 + $0x80] sm:$0xff]  ;;  %v206_v42 = vld [vmem:[%s3917_s10 + $0x8] sm:$0xff] }
  0x39   : > { %1236 = vmatpush.bf16.msrb.mxu0 %v3479_v54  ;;  %v3475_v54 = vld [vmem:[%s4770_s1 + $0x8] sm:$0xff]  ;;  %v207_v44 = vld [vmem:[%s3917_s10 + $0x10] sm:$0xff]  ;;  %v208_v46 = vld [vmem:[%s3917_s10 + $0x18] sm:$0xff] }
  0x3a   : > { %1285 = vmatpush.bf16.msrb.mxu1 %v3487_v55  ;;  %v3483_v55 = vld [vmem:[%s4770_s1 + $0x48] sm:$0xff]  ;;  %v223_v45 = vld [vmem:[%s3917_s10 + $0x90] sm:$0xff]  ;;  %v224_v47 = vld [vmem:[%s3917_s10 + $0x98] sm:$0xff] }
  0x3b   : > { %1334 = vmatpush.bf16.msrb.mxu2 %v3495_v52  ;;  %v3491_v52 = vld [vmem:[%s4770_s1 + $0x88] sm:$0xff] }
  0x3c   : > { %1383 = vmatpush.bf16.msrb.mxu3 %v3503_v53  ;;  %v3499_v53 = vld [vmem:[%s4770_s1 + $0xc8] sm:$0xff] }
  0x3d   : > { %1237 = vmatpush.bf16.msrb.mxu0 %v3478_v6  ;;  %v3474_v6 = vld [vmem:[%s4770_s1] sm:$0xff]  ;;  %v222_v43 = vld [vmem:[%s3917_s10 + $0x88] sm:$0xff] }
  0x3e   : > { %1286 = vmatpush.bf16.msrb.mxu1 %v3486_v7  ;;  %v3482_v7 = vld [vmem:[%s4770_s1 + $0x40] sm:$0xff] }
  0x3f   : > { %1335 = vmatpush.bf16.msrb.mxu2 %v3494_v4  ;;  %v3490_v4 = vld [vmem:[%s4770_s1 + $0x80] sm:$0xff] }
  0x40   : > { %859 = vmatmul.bf16.gmra.mxu0 %v561_v0  ;;  %1384 = vmatpush.bf16.msrb.mxu3 %v3502_v5  ;;  %v577_v0 = vpack.c.bf16 %v385_v57, %v369_v56  ;;  %v3498_v5 = vld [vmem:[%s4770_s1 + $0xc0] sm:$0xff]  ;;  %v3567_v56 = vld [vmem:[%s4770_s1 + $0x2e8] sm:$0xff] }
  0x41   : > { %908 = vmatmul.bf16.gmra.mxu1 %v562_v1  ;;  %1238 = vmatpush.bf16.msrb.mxu0 %v3477_v22  ;;  %v578_v1 = vpack.c.bf16 %v386_v59, %v370_v58  ;;  %v3545_v22 = vld [vmem:[%s4770_s1 + $0x238] sm:$0xff] }
  0x42   : > { %957 = vmatmul.bf16.gmra.mxu2 %v563_v2  ;;  %1287 = vmatpush.bf16.msrb.mxu1 %v3485_v23  ;;  %v579_v2 = vpack.c.bf16 %v387_v61, %v371_v60  ;;  %v3553_v23 = vld [vmem:[%s4770_s1 + $0x278] sm:$0xff] }
  0x43   : > { %1006 = vmatmul.bf16.gmra.mxu3 %v564_v3  ;;  %1336 = vmatpush.bf16.msrb.mxu2 %v3493_v20  ;;  %v580_v3 = vpack.c.bf16 %v388_v63, %v372_v62  ;;  %v3561_v20 = vld [vmem:[%s4770_s1 + $0x2b8] sm:$0xff] }
  0x44   : > { %1385 = vmatpush.bf16.msrb.mxu3 %v3501_v21  ;;  %v3569_v21 = vld [vmem:[%s4770_s1 + $0x2f8] sm:$0xff] }
  0x45   : > { %1239 = vmatpush.bf16.msrb.mxu0 %v3476_v38  ;;  %v3544_v38 = vld [vmem:[%s4770_s1 + $0x230] sm:$0xff] }
  0x46   : > { %1288 = vmatpush.bf16.msrb.mxu1 %v3484_v39  ;;  %v3552_v39 = vld [vmem:[%s4770_s1 + $0x270] sm:$0xff] }
  0x47   : > { %1337 = vmatpush.bf16.msrb.mxu2 %v3492_v36  ;;  %v3560_v36 = vld [vmem:[%s4770_s1 + $0x2b0] sm:$0xff] }
  0x48   : > { %1386 = vmatpush.bf16.msrb.mxu3 %v3500_v37  ;;  %v3568_v37 = vld [vmem:[%s4770_s1 + $0x2f0] sm:$0xff] }
  0x49   : > { %1240 = vmatpush.bf16.msrb.mxu0 %v3475_v54 }
  0x4a   : > { %1289 = vmatpush.bf16.msrb.mxu1 %v3483_v55  ;;  %v3559_v55 = vld [vmem:[%s4770_s1 + $0x2a8] sm:$0xff] }
  0x4b   : > { %1338 = vmatpush.bf16.msrb.mxu2 %v3491_v52  ;;  %v463_v52 = vpack.c.bf16 %v223_v45, %v207_v44 }
  0x4c   : > { %1387 = vmatpush.bf16.msrb.mxu3 %v3499_v53  ;;  %v464_v53 = vpack.c.bf16 %v224_v47, %v208_v46 }
  0x4d   : > { %1241 = vmatpush.bf16.msrb.mxu0 %v3474_v6  ;;  %v239_v6 = vld [vmem:[%s3917_s10 + $0x110] sm:$0xff] }
  0x4e   : > { %1290 = vmatpush.bf16.msrb.mxu1 %v3482_v7  ;;  %v255_v7 = vld [vmem:[%s3917_s10 + $0x190] sm:$0xff] }
  0x4f   : > { %1339 = vmatpush.bf16.msrb.mxu2 %v3490_v4  ;;  %v238_v4 = vld [vmem:[%s3917_s10 + $0x108] sm:$0xff] }
  0x50   : > { %864 = vmatmul.bf16.gmra.mxu0 %v565_v16  ;;  %1388 = vmatpush.bf16.msrb.mxu3 %v3498_v5  ;;  %v581_v16 = vpack.c.bf16 %v417_v9, %v401_v8  ;;  %v254_v5 = vld [vmem:[%s3917_s10 + $0x188] sm:$0xff]  ;;  %v240_v8 = vld [vmem:[%s3917_s10 + $0x118] sm:$0xff] }
  0x51   : > { %913 = vmatmul.bf16.gmra.mxu1 %v566_v17  ;;  %v582_v17 = vpack.c.bf16 %v418_v11, %v402_v10  ;;  %1719 = vmatpush.bf16.msra.mxu0 %v3545_v22  ;;  %v256_v9 = vld [vmem:[%s3917_s10 + $0x198] sm:$0xff]  ;;  %v3566_v22 = vld [vmem:[%s4770_s1 + $0x2e0] sm:$0xff] }
  0x52   : > { %962 = vmatmul.bf16.gmra.mxu2 %v567_v18  ;;  %v583_v18 = vpack.c.bf16 %v419_v13, %v403_v12  ;;  %1768 = vmatpush.bf16.msra.mxu1 %v3553_v23  ;;  %v466_v13 = vpack.c.bf16 %v254_v5, %v238_v4  ;;  %v319_v4 = vld [vmem:[%s3917_s10 + $0x390] sm:$0xff]  ;;  %v304_v5 = vld [vmem:[%s3917_s10 + $0x318] sm:$0xff] }
  0x53   : > { %1011 = vmatmul.bf16.gmra.mxu3 %v568_v19  ;;  %v584_v19 = vpack.c.bf16 %v420_v15, %v404_v14  ;;  %1817 = vmatpush.bf16.msra.mxu2 %v3561_v20 }
  0x54   : > { %1866 = vmatpush.bf16.msra.mxu3 %v3569_v21  ;;  %v3558_v21 = vld [vmem:[%s4770_s1 + $0x2a0] sm:$0xff] }
  0x55   : > { %1720 = vmatpush.bf16.msra.mxu0 %v3544_v38  ;;  %v272_v38 = vld [vmem:[%s3917_s10 + $0x218] sm:$0xff] }
  0x56   : > { %1769 = vmatpush.bf16.msra.mxu1 %v3552_v39  ;;  %v288_v39 = vld [vmem:[%s3917_s10 + $0x298] sm:$0xff] }
  0x57   : > { %1818 = vmatpush.bf16.msra.mxu2 %v3560_v36  ;;  %v271_v36 = vld [vmem:[%s3917_s10 + $0x210] sm:$0xff] }
  0x58   : > { %1867 = vmatpush.bf16.msra.mxu3 %v3568_v37  ;;  %v287_v37 = vld [vmem:[%s3917_s10 + $0x290] sm:$0xff] }
  0x59   : > { %v471_v47 = vpack.c.bf16 %v287_v37, %v271_v36  ;;  %v351_v36 = vld [vmem:[%s3917_s10 + $0x490] sm:$0xff]  ;;  %v336_v37 = vld [vmem:[%s3917_s10 + $0x418] sm:$0xff] }
  0x5b   : > { %1819 = vmatpush.bf16.msra.mxu2 %v3559_v55 }
  0x5c   : > { %1868 = vmatpush.bf16.msra.mxu3 %v3567_v56 }
  0x5f   : > { %1820 = vmatpush.bf16.msra.mxu2 %v3558_v21 }
  0x60   : > { %869 = vmatmul.bf16.gmra.mxu0 %v569_v32  ;;  %v585_v32 = vpack.c.bf16 %v449_v25, %v433_v24  ;;  %1869 = vmatpush.bf16.msra.mxu3 %v3566_v22 }
  0x61   : > { %918 = vmatmul.bf16.gmra.mxu1 %v570_v33  ;;  %v586_v33 = vpack.c.bf16 %v450_v27, %v434_v26 }
  0x62   : > { %967 = vmatmul.bf16.gmra.mxu2 %v571_v34  ;;  %v587_v34 = vpack.c.bf16 %v451_v29, %v435_v28 }
  0x63   : > { %1016 = vmatmul.bf16.gmra.mxu3 %v572_v35  ;;  %v588_v35 = vpack.c.bf16 %v452_v31, %v436_v30  ;;  %v3542_v30 = vld [vmem:[%s4770_s1 + $0x220] sm:$0xff] }
  0x64   : > { %v3550_v31 = vld [vmem:[%s4770_s1 + $0x260] sm:$0xff] }
  0x70   : > { %874 = vmatmul.bf16.gmra.mxu0 %v573_v48  ;;  %v461_v48 = vpack.c.bf16 %v221_v41, %v205_v40 }
  0x71   : > { %923 = vmatmul.bf16.gmra.mxu1 %v574_v49  ;;  %v462_v49 = vpack.c.bf16 %v222_v43, %v206_v42 }
  0x72   : > { %972 = vmatmul.bf16.gmra.mxu2 %v575_v50 }
  0x73   : > { %1021 = vmatmul.bf16.gmra.mxu3 %v576_v51 }
  0x80   : > { %879 = vmatmul.bf16.gmra.mxu0 %v577_v0  ;;  %v3543_v0 = vld [vmem:[%s4770_s1 + $0x228] sm:$0xff] }
  0x81   : > { %928 = vmatmul.bf16.gmra.mxu1 %v578_v1  ;;  %v3551_v1 = vld [vmem:[%s4770_s1 + $0x268] sm:$0xff]  ;;  %1721 = vmatpush.bf16.msra.mxu0 %v3543_v0  ;;  %v317_v0 = vld [vmem:[%s3917_s10 + $0x380] sm:$0xff] }
  0x82   : > { %977 = vmatmul.bf16.gmra.mxu2 %v579_v2  ;;  %v237_v2 = vld [vmem:[%s3917_s10 + $0x100] sm:$0xff]  ;;  %1770 = vmatpush.bf16.msra.mxu1 %v3551_v1  ;;  %v302_v1 = vld [vmem:[%s3917_s10 + $0x308] sm:$0xff] }
  0x83   : > { %1026 = vmatmul.bf16.gmra.mxu3 %v580_v3  ;;  %v253_v3 = vld [vmem:[%s3917_s10 + $0x180] sm:$0xff] }
  0x84   : > { %v465_v12 = vpack.c.bf16 %v253_v3, %v237_v2  ;;  %v318_v2 = vld [vmem:[%s3917_s10 + $0x388] sm:$0xff]  ;;  %v303_v3 = vld [vmem:[%s3917_s10 + $0x310] sm:$0xff] }
  0x85   : > { %1722 = vmatpush.bf16.msra.mxu0 %v3542_v30  ;;  %v3548_v30 = vld [vmem:[%s4770_s1 + $0x250] sm:$0xff] }
  0x86   : > { %1771 = vmatpush.bf16.msra.mxu1 %v3550_v31  ;;  %v333_v31 = vld [vmem:[%s3917_s10 + $0x400] sm:$0xff] }
  0x90   : > { %884 = vmatmul.bf16.gmra.mxu0 %v581_v16 }
  0x91   : > { %933 = vmatmul.bf16.gmra.mxu1 %v582_v17  ;;  %v467_v17 = vpack.c.bf16 %v255_v7, %v239_v6  ;;  %v320_v6 = vld [vmem:[%s3917_s10 + $0x398] sm:$0xff] }
  0x92   : > { %982 = vmatmul.bf16.gmra.mxu2 %v583_v18  ;;  %v468_v18 = vpack.c.bf16 %v256_v9, %v240_v8 }
  0x93   : > { %1031 = vmatmul.bf16.gmra.mxu3 %v584_v19 }
  0xa0   : > { %889 = vmatmul.bf16.gmra.mxu0 %v585_v32  ;;  %v269_v32 = vld [vmem:[%s3917_s10 + $0x200] sm:$0xff] }
  0xa1   : > { %938 = vmatmul.bf16.gmra.mxu1 %v586_v33  ;;  %v285_v33 = vld [vmem:[%s3917_s10 + $0x280] sm:$0xff] }
  0xa2   : > { %987 = vmatmul.bf16.gmra.mxu2 %v587_v34  ;;  %v270_v34 = vld [vmem:[%s3917_s10 + $0x208] sm:$0xff]  ;;  %v469_v42 = vpack.c.bf16 %v285_v33, %v269_v32  ;;  %v349_v32 = vld [vmem:[%s3917_s10 + $0x480] sm:$0xff] }
  0xa3   : > { %1036 = vmatmul.bf16.gmra.mxu3 %v588_v35  ;;  %v286_v35 = vld [vmem:[%s3917_s10 + $0x288] sm:$0xff] }
  0xa4   : > { %v470_v43 = vpack.c.bf16 %v286_v35, %v270_v34  ;;  %v334_v33 = vld [vmem:[%s3917_s10 + $0x408] sm:$0xff]  ;;  %v335_v35 = vld [vmem:[%s3917_s10 + $0x410] sm:$0xff] }
  0xa5   : > { %v350_v34 = vld [vmem:[%s3917_s10 + $0x488] sm:$0xff] }
  0xad   : > { %v855_v50 = vpop.f32.mrf.mxu0 }
  0xae   : > { %v904_v51 = vpop.f32.mrf.mxu1 }
  0xaf   : > { %v905_v54 = vadd.f32 %v904_v51, %v855_v50  ;;  %v3557_v51 = vld [vmem:[%s4770_s1 + $0x298] sm:$0xff] }
  0xb0   : > { %1242 = vmatmul.bf16.vlgmr.msrb.gmra.mxu0 %v461_v48  ;;  %v472_v48 = vpack.c.bf16 %v288_v39, %v272_v38  ;;  %1821 = vmatpush.bf16.msra.mxu2 %v3557_v51  ;;  %v352_v38 = vld [vmem:[%s3917_s10 + $0x498] sm:$0xff]  ;;  %v3555_v51 = vld [vmem:[%s4770_s1 + $0x288] sm:$0xff] }
  0xb1   : > { %1291 = vmatmul.bf16.vlgmr.msrb.gmra.mxu1 %v462_v49 }
  0xb2   : > { %1340 = vmatmul.bf16.vlgmr.msrb.gmra.mxu2 %v463_v52  ;;  %v3565_v52 = vld [vmem:[%s4770_s1 + $0x2d8] sm:$0xff] }
  0xb3   : > { %1389 = vmatmul.bf16.vlgmr.msrb.gmra.mxu3 %v464_v53 }
  0xb4   : > { %1870 = vmatpush.bf16.msra.mxu3 %v3565_v52  ;;  %v3563_v52 = vld [vmem:[%s4770_s1 + $0x2c8] sm:$0xff] }
  0xb5   : > { %v953_v57 = vpop.f32.mrf.mxu2  ;;  %v857_v60 = vpop.f32.mrf.mxu0 }
  0xb6   : > { %v1002_v58 = vpop.f32.mrf.mxu3  ;;  %v954_v59 = vadd.f32 %v953_v57, %v905_v54  ;;  %v906_v61 = vpop.f32.mrf.mxu1 }
  0xb7   : > { %v907_v62 = vadd.f32 %v906_v61, %v857_v60  ;;  %v3541_v60 = vld [vmem:[%s4770_s1 + $0x218] sm:$0xff] }
  0xb8   : > { %v4135_v63 = vadd.f32 %v1002_v58, %v954_v59  ;;  %v3549_v61 = vld [vmem:[%s4770_s1 + $0x258] sm:$0xff]  ;;  %1723 = vmatpush.bf16.msra.mxu0 %v3541_v60 }
  0xb9   : > { %1772 = vmatpush.bf16.msra.mxu1 %v3549_v61  ;;  %v3539_v61 = vld [vmem:[%s4770_s1 + $0x208] sm:$0xff] }
  0xbd   : > { %v955_v10 = vpop.f32.mrf.mxu2  ;;  %v860_v15 = vpop.f32.mrf.mxu0  ;;  %1773 = vmatpush.bf16.msra.mxu1 %v3548_v30 }
  0xbe   : > { %v1004_v11 = vpop.f32.mrf.mxu3  ;;  %v956_v14 = vadd.f32 %v955_v10, %v907_v62  ;;  %v909_v16 = vpop.f32.mrf.mxu1  ;;  %v301_v62 = vld [vmem:[%s3917_s10 + $0x300] sm:$0xff]  ;;  %v474_v10 = vpack.c.bf16 %v318_v2, %v302_v1  ;;  %v366_v2 = vld [vmem:[%s3917_s10 + $0x508] sm:$0xff] }
  0xbf   : > { %v910_v19 = vadd.f32 %v909_v16, %v860_v15  ;;  %v473_v9 = vpack.c.bf16 %v317_v0, %v301_v62  ;;  %v476_v15 = vpack.c.bf16 %v320_v6, %v304_v5  ;;  %v3547_v62 = vld [vmem:[%s4770_s1 + $0x248] sm:$0xff]  ;;  %v365_v0 = vld [vmem:[%s3917_s10 + $0x500] sm:$0xff]  ;;  %v383_v5 = vld [vmem:[%s3917_s10 + $0x590] sm:$0xff] }
  0xc0   : > { %v4151_v20 = vadd.f32 %v1004_v11, %v956_v14  ;;  %1247 = vmatmul.bf16.gmra.mxu0 %v465_v12  ;;  %v475_v14 = vpack.c.bf16 %v319_v4, %v303_v3  ;;  %v381_v1 = vld [vmem:[%s3917_s10 + $0x580] sm:$0xff]  ;;  %v382_v3 = vld [vmem:[%s3917_s10 + $0x588] sm:$0xff]  ;;  %v367_v4 = vld [vmem:[%s3917_s10 + $0x510] sm:$0xff] }
  0xc1   : > { %1296 = vmatmul.bf16.gmra.mxu1 %v466_v13  ;;  %v368_v6 = vld [vmem:[%s3917_s10 + $0x518] sm:$0xff] }
  0xc2   : > { %1345 = vmatmul.bf16.gmra.mxu2 %v467_v17  ;;  %1774 = vmatpush.bf16.msra.mxu1 %v3547_v62 }
  0xc3   : > { %1394 = vmatmul.bf16.gmra.mxu3 %v468_v18  ;;  %v3556_v18 = vld [vmem:[%s4770_s1 + $0x290] sm:$0xff] }
  0xc4   : > { %1822 = vmatpush.bf16.msra.mxu2 %v3556_v18 }
  0xc5   : > { %v958_v23 = vpop.f32.mrf.mxu2  ;;  %v862_v26 = vpop.f32.mrf.mxu0 }
  0xc6   : > { %v1007_v24 = vpop.f32.mrf.mxu3  ;;  %v959_v25 = vadd.f32 %v958_v23, %v910_v19  ;;  %v911_v27 = vpop.f32.mrf.mxu1  ;;  %v3564_v19 = vld [vmem:[%s4770_s1 + $0x2d0] sm:$0xff] }
  0xc7   : > { %v912_v28 = vadd.f32 %v911_v27, %v862_v26  ;;  %1871 = vmatpush.bf16.msra.mxu3 %v3564_v19 }
  0xc8   : > { %v4159_v29 = vadd.f32 %v1007_v24, %v959_v25  ;;  %1823 = vmatpush.bf16.msra.mxu2 %v3555_v51 }
  0xcb   : > { %1872 = vmatpush.bf16.msra.mxu3 %v3563_v52 }
  0xcd   : > { %v960_v40 = vpop.f32.mrf.mxu2  ;;  %v865_v45 = vpop.f32.mrf.mxu0 }
  0xce   : > { %v1009_v41 = vpop.f32.mrf.mxu3  ;;  %v961_v44 = vadd.f32 %v960_v40, %v912_v28  ;;  %v914_v46 = vpop.f32.mrf.mxu1  ;;  %v3540_v28 = vld [vmem:[%s4770_s1 + $0x210] sm:$0xff] }
  0xcf   : > { %v915_v49 = vadd.f32 %v914_v46, %v865_v45  ;;  %1724 = vmatpush.bf16.msra.mxu0 %v3540_v28  ;;  %v479_v46 = vpack.c.bf16 %v351_v36, %v335_v35  ;;  %v413_v35 = vld [vmem:[%s3917_s10 + $0x680] sm:$0xff]  ;;  %v398_v36 = vld [vmem:[%s3917_s10 + $0x608] sm:$0xff] }
  0xd0   : > { %v4175_v50 = vadd.f32 %v1009_v41, %v961_v44  ;;  %1252 = vmatmul.bf16.gmra.mxu0 %v469_v42  ;;  %v477_v41 = vpack.c.bf16 %v349_v32, %v333_v31  ;;  %v478_v42 = vpack.c.bf16 %v350_v34, %v334_v33  ;;  %v3538_v32 = vld [vmem:[%s4770_s1 + $0x200] sm:$0xff] }
  0xd1   : > { %1301 = vmatmul.bf16.gmra.mxu1 %v470_v43  ;;  %v3546_v33 = vld [vmem:[%s4770_s1 + $0x240] sm:$0xff] }
  0xd2   : > { %1350 = vmatmul.bf16.gmra.mxu2 %v471_v47  ;;  %v480_v47 = vpack.c.bf16 %v352_v38, %v336_v37  ;;  %v397_v34 = vld [vmem:[%s3917_s10 + $0x600] sm:$0xff]  ;;  %v414_v37 = vld [vmem:[%s3917_s10 + $0x688] sm:$0xff]  ;;  %v399_v38 = vld [vmem:[%s3917_s10 + $0x610] sm:$0xff]  ;;  %1775 = vmatpush.bf16.msra.mxu1 %v3546_v33 }
  0xd3   : > { %1399 = vmatmul.bf16.gmra.mxu3 %v472_v48  ;;  %1725 = vmatpush.bf16.msra.mxu0 %v3539_v61 }
  0xd5   : > { %v963_v53 = vpop.f32.mrf.mxu2  ;;  %v867_v56 = vpop.f32.mrf.mxu0 }
  0xd6   : > { %v1012_v54 = vpop.f32.mrf.mxu3  ;;  %v964_v55 = vadd.f32 %v963_v53, %v915_v49  ;;  %v916_v57 = vpop.f32.mrf.mxu1 }
  0xd7   : > { %v917_v58 = vadd.f32 %v916_v57, %v867_v56  ;;  %1726 = vmatpush.bf16.msra.mxu0 %v3538_v32 }
  0xd8   : > { %v4183_v59 = vadd.f32 %v1012_v54, %v964_v55 }
  0xdd   : > { %v965_v7 = vpop.f32.mrf.mxu2  ;;  %v870_v12 = vpop.f32.mrf.mxu0 }
  0xde   : > { %v1014_v8 = vpop.f32.mrf.mxu3  ;;  %v966_v11 = vadd.f32 %v965_v7, %v917_v58  ;;  %v919_v13 = vpop.f32.mrf.mxu1  ;;  %v384_v7 = vld [vmem:[%s3917_s10 + $0x598] sm:$0xff] }
  0xdf   : > { %v920_v16 = vadd.f32 %v919_v13, %v870_v12 }
  0xe0   : > { %v4199_v17 = vadd.f32 %v1014_v8, %v966_v11  ;;  %1257 = vmatmul.bf16.gmra.mxu0 %v473_v9  ;;  %v482_v11 = vpack.c.bf16 %v382_v3, %v366_v2  ;;  %v3577_v3 = vld [vmem:[%s4770_s1 + $0x338] sm:$0xff] }
  0xe1   : > { %1306 = vmatmul.bf16.gmra.mxu1 %v474_v10  ;;  %v481_v10 = vpack.c.bf16 %v381_v1, %v365_v0  ;;  %2220 = vmatpush.bf16.msrb.mxu0 %v3577_v3 }
  0xe2   : > { %1355 = vmatmul.bf16.gmra.mxu2 %v475_v14 }
  0xe3   : > { %1404 = vmatmul.bf16.gmra.mxu3 %v476_v15  ;;  %v483_v15 = vpack.c.bf16 %v383_v5, %v367_v4  ;;  %v3585_v4 = vld [vmem:[%s4770_s1 + $0x378] sm:$0xff]  ;;  %v429_v5 = vld [vmem:[%s3917_s10 + $0x700] sm:$0xff] }
  0xe4   : > { %2269 = vmatpush.bf16.msrb.mxu1 %v3585_v4  ;;  %v3591_v4 = vld [vmem:[%s4770_s1 + $0x3a8] sm:$0xff] }
  0xe5   : > { %v968_v21 = vpop.f32.mrf.mxu2  ;;  %v872_v24 = vpop.f32.mrf.mxu0 }
  0xe6   : > { %v1017_v22 = vpop.f32.mrf.mxu3  ;;  %v969_v23 = vadd.f32 %v968_v21, %v920_v16  ;;  %v921_v25 = vpop.f32.mrf.mxu1  ;;  %v484_v16 = vpack.c.bf16 %v384_v7, %v368_v6  ;;  %v3554_v21 = vld [vmem:[%s4770_s1 + $0x280] sm:$0xff]  ;;  %v430_v7 = vld [vmem:[%s3917_s10 + $0x708] sm:$0xff] }
  0xe7   : > { %v922_v26 = vadd.f32 %v921_v25, %v872_v24  ;;  %1824 = vmatpush.bf16.msra.mxu2 %v3554_v21  ;;  %v445_v6 = vld [vmem:[%s3917_s10 + $0x780] sm:$0xff] }
  0xe8   : > { %v4207_v27 = vadd.f32 %v1017_v22, %v969_v23  ;;  %v3562_v22 = vld [vmem:[%s4770_s1 + $0x2c0] sm:$0xff] }
  0xe9   : > { %1873 = vmatpush.bf16.msra.mxu3 %v3562_v22 }
  0xed   : > { %v970_v39 = vpop.f32.mrf.mxu2  ;;  %v875_v44 = vpop.f32.mrf.mxu0 }
  0xee   : > { %v1019_v40 = vpop.f32.mrf.mxu3  ;;  %v971_v43 = vadd.f32 %v970_v39, %v922_v26  ;;  %v924_v45 = vpop.f32.mrf.mxu1  ;;  %v415_v39 = vld [vmem:[%s3917_s10 + $0x690] sm:$0xff] }
  0xef   : > { %v925_v48 = vadd.f32 %v924_v45, %v875_v44  ;;  %v485_v44 = vpack.c.bf16 %v413_v35, %v397_v34  ;;  %v486_v45 = vpack.c.bf16 %v414_v37, %v398_v36  ;;  %v487_v51 = vpack.c.bf16 %v415_v39, %v399_v38  ;;  %v3576_v39 = vld [vmem:[%s4770_s1 + $0x330] sm:$0xff] }
  0xf0   : > { %v4223_v49 = vadd.f32 %v1019_v40, %v971_v43  ;;  %1262 = vmatmul.bf16.gmra.mxu0 %v477_v41  ;;  %v400_v40 = vld [vmem:[%s3917_s10 + $0x618] sm:$0xff] }
  0xf1   : > { %1311 = vmatmul.bf16.gmra.mxu1 %v478_v42  ;;  %v416_v41 = vld [vmem:[%s3917_s10 + $0x698] sm:$0xff]  ;;  %2221 = vmatpush.bf16.msrb.mxu0 %v3576_v39 }
  0xf2   : > { %1360 = vmatmul.bf16.gmra.mxu2 %v479_v46  ;;  %v488_v52 = vpack.c.bf16 %v416_v41, %v400_v40  ;;  %v3584_v40 = vld [vmem:[%s4770_s1 + $0x370] sm:$0xff]  ;;  %v213_v41 = vld [vmem:[%s3917_s10 + $0x40] sm:$0xff] }
  0xf3   : > { %1409 = vmatmul.bf16.gmra.mxu3 %v480_v47  ;;  %2270 = vmatpush.bf16.msrb.mxu1 %v3584_v40 }
  0xf5   : > { %v973_v53 = vpop.f32.mrf.mxu2  ;;  %v877_v56 = vpop.f32.mrf.mxu0 }
  0xf6   : > { %v1022_v54 = vpop.f32.mrf.mxu3  ;;  %v974_v55 = vadd.f32 %v973_v53, %v925_v48  ;;  %v926_v57 = vpop.f32.mrf.mxu1 }
  0xf7   : > { %v927_v58 = vadd.f32 %v926_v57, %v877_v56  ;;  %v3601_v56 = vld [vmem:[%s4770_s1 + $0x3f8] sm:$0xff] }
  0xf8   : > { %v4231_v60 = vadd.f32 %v1022_v54, %v974_v55  ;;  %v3593_v55 = vld [vmem:[%s4770_s1 + $0x3b8] sm:$0xff]  ;;  %2367 = vmatpush.bf16.msrb.mxu3 %v3601_v56 }
  0xf9   : > { %2318 = vmatpush.bf16.msrb.mxu2 %v3593_v55 }
  0xfd   : > { %v975_v8 = vpop.f32.mrf.mxu2  ;;  %v880_v13 = vpop.f32.mrf.mxu0 }
  0xfe   : > { %v1024_v9 = vpop.f32.mrf.mxu3  ;;  %v976_v12 = vadd.f32 %v975_v8, %v927_v58  ;;  %v929_v14 = vpop.f32.mrf.mxu1  ;;  %v446_v8 = vld [vmem:[%s3917_s10 + $0x788] sm:$0xff] }
  0xff   : > { %v930_v18 = vadd.f32 %v929_v14, %v880_v13 }
 0x100   : > { %v4247_v19 = vadd.f32 %v1024_v9, %v976_v12  ;;  %1267 = vmatmul.bf16.gmra.mxu0 %v481_v10  ;;  %v431_v9 = vld [vmem:[%s3917_s10 + $0x710] sm:$0xff]  ;;  %v448_v12 = vld [vmem:[%s3917_s10 + $0x798] sm:$0xff] }
 0x101   : > { %1316 = vmatmul.bf16.gmra.mxu1 %v482_v11  ;;  %v447_v10 = vld [vmem:[%s3917_s10 + $0x790] sm:$0xff]  ;;  %v432_v11 = vld [vmem:[%s3917_s10 + $0x718] sm:$0xff] }
 0x102   : > { %1365 = vmatmul.bf16.gmra.mxu2 %v483_v15  ;;  %v489_v15 = vpack.c.bf16 %v445_v6, %v429_v5  ;;  %v3599_v5 = vld [vmem:[%s4770_s1 + $0x3e8] sm:$0xff] }
 0x103   : > { %1414 = vmatmul.bf16.gmra.mxu3 %v484_v16  ;;  %v490_v16 = vpack.c.bf16 %v446_v8, %v430_v7 }
 0x105   : > { %v978_v23 = vpop.f32.mrf.mxu2  ;;  %v882_v26 = vpop.f32.mrf.mxu0 }
 0x106   : > { %v1027_v24 = vpop.f32.mrf.mxu3  ;;  %v979_v25 = vadd.f32 %v978_v23, %v930_v18  ;;  %v931_v28 = vpop.f32.mrf.mxu1  ;;  %v491_v23 = vpack.c.bf16 %v447_v10, %v431_v9 }
 0x107   : > { %v932_v30 = vadd.f32 %v931_v28, %v882_v26  ;;  %v3592_v28 = vld [vmem:[%s4770_s1 + $0x3b0] sm:$0xff] }
 0x108   : > { %v4255_v31 = vadd.f32 %v1027_v24, %v979_v25  ;;  %v492_v24 = vpack.c.bf16 %v448_v12, %v432_v11  ;;  %2319 = vmatpush.bf16.msrb.mxu2 %v3592_v28  ;;  %v3575_v12 = vld [vmem:[%s4770_s1 + $0x328] sm:$0xff] }
 0x109   : > { %2222 = vmatpush.bf16.msrb.mxu0 %v3575_v12 }
 0x10c   : > { %2320 = vmatpush.bf16.msrb.mxu2 %v3591_v4 }
 0x10d   : > { %v980_v42 = vpop.f32.mrf.mxu2  ;;  %v885_v47 = vpop.f32.mrf.mxu0 }
 0x10e   : > { %v1029_v43 = vpop.f32.mrf.mxu3  ;;  %v981_v46 = vadd.f32 %v980_v42, %v932_v30  ;;  %v934_v48 = vpop.f32.mrf.mxu1  ;;  %v3600_v30 = vld [vmem:[%s4770_s1 + $0x3f0] sm:$0xff]  ;;  %v229_v42 = vld [vmem:[%s3917_s10 + $0xc0] sm:$0xff] }
 0x10f   : > { %v935_v53 = vadd.f32 %v934_v48, %v885_v47  ;;  %2368 = vmatpush.bf16.msrb.mxu3 %v3600_v30  ;;  %v216_v47 = vld [vmem:[%s3917_s10 + $0x58] sm:$0xff] }
 0x110   : > { %v4271_v54 = vadd.f32 %v1029_v43, %v981_v46  ;;  %1272 = vmatmul.bf16.gmra.mxu0 %v485_v44  ;;  %v214_v43 = vld [vmem:[%s3917_s10 + $0x48] sm:$0xff]  ;;  %v231_v46 = vld [vmem:[%s3917_s10 + $0xd0] sm:$0xff]  ;;  %v232_v48 = vld [vmem:[%s3917_s10 + $0xd8] sm:$0xff] }
 0x111   : > { %1321 = vmatmul.bf16.gmra.mxu1 %v486_v45  ;;  %v230_v44 = vld [vmem:[%s3917_s10 + $0xc8] sm:$0xff]  ;;  %v215_v45 = vld [vmem:[%s3917_s10 + $0x50] sm:$0xff] }
 0x112   : > { %1370 = vmatmul.bf16.gmra.mxu2 %v487_v51  ;;  %v1431_v55 = vpack.c.bf16 %v230_v44, %v214_v43  ;;  %v3598_v43 = vld [vmem:[%s4770_s1 + $0x3e0] sm:$0xff] }
 0x113   : > { %1419 = vmatmul.bf16.gmra.mxu3 %v488_v52 }
 0x114   : > { %2369 = vmatpush.bf16.msrb.mxu3 %v3599_v5 }
 0x115   : > { %v983_v57 = vpop.f32.mrf.mxu2  ;;  %v887_v62 = vpop.f32.mrf.mxu0 }
 0x116   : > { %v1032_v58 = vpop.f32.mrf.mxu3  ;;  %v984_v61 = vadd.f32 %v983_v57, %v935_v53  ;;  %v936_v0 = vpop.f32.mrf.mxu1  ;;  %v1430_v53 = vpack.c.bf16 %v229_v42, %v213_v41  ;;  %v3590_v42 = vld [vmem:[%s4770_s1 + $0x3a0] sm:$0xff] }
 0x117   : > { %v937_v1 = vadd.f32 %v936_v0, %v887_v62  ;;  %v1433_v62 = vpack.c.bf16 %v232_v48, %v216_v47  ;;  %2321 = vmatpush.bf16.msrb.mxu2 %v3590_v42 }
 0x118   : > { %v4279_v2 = vadd.f32 %v1032_v58, %v984_v61  ;;  %v1432_v61 = vpack.c.bf16 %v231_v46, %v215_v45  ;;  %2370 = vmatpush.bf16.msrb.mxu3 %v3598_v43 }
 0x11d   : > { %v985_v13 = vpop.f32.mrf.mxu2  ;;  %v890_v21 = vpop.f32.mrf.mxu0 }
 0x11e   : > { %v1034_v14 = vpop.f32.mrf.mxu3  ;;  %v986_v18 = vadd.f32 %v985_v13, %v937_v1  ;;  %v939_v22 = vpop.f32.mrf.mxu1  ;;  %v3583_v13 = vld [vmem:[%s4770_s1 + $0x368] sm:$0xff] }
 0x11f   : > { %v940_v25 = vadd.f32 %v939_v22, %v890_v21  ;;  %v262_v21 = vld [vmem:[%s3917_s10 + $0x1c8] sm:$0xff]  ;;  %v247_v22 = vld [vmem:[%s3917_s10 + $0x150] sm:$0xff]  ;;  %2271 = vmatpush.bf16.msrb.mxu1 %v3583_v13 }
 0x120   : > { %v4295_v26 = vadd.f32 %v1034_v14, %v986_v18  ;;  %1277 = vmatmul.bf16.gmra.mxu0 %v489_v15  ;;  %v245_v15 = vld [vmem:[%s3917_s10 + $0x140] sm:$0xff]  ;;  %v246_v18 = vld [vmem:[%s3917_s10 + $0x148] sm:$0xff] }
 0x121   : > { %1326 = vmatmul.bf16.gmra.mxu1 %v490_v16  ;;  %v261_v16 = vld [vmem:[%s3917_s10 + $0x1c0] sm:$0xff] }
 0x122   : > { %1375 = vmatmul.bf16.gmra.mxu2 %v491_v23  ;;  %v263_v23 = vld [vmem:[%s3917_s10 + $0x1d0] sm:$0xff]  ;;  %v1434_v30 = vpack.c.bf16 %v261_v16, %v245_v15  ;;  %v3589_v16 = vld [vmem:[%s4770_s1 + $0x398] sm:$0xff] }
 0x123   : > { %1424 = vmatmul.bf16.gmra.mxu3 %v492_v24  ;;  %v264_v24 = vld [vmem:[%s3917_s10 + $0x1d8] sm:$0xff]  ;;  %2322 = vmatpush.bf16.msrb.mxu2 %v3589_v16 }
 0x125   : > { %v988_v32 = vpop.f32.mrf.mxu2  ;;  %v892_v35 = vpop.f32.mrf.mxu0 }
 0x126   : > { %v1037_v33 = vpop.f32.mrf.mxu3  ;;  %v989_v34 = vadd.f32 %v988_v32, %v940_v25  ;;  %v941_v36 = vpop.f32.mrf.mxu1  ;;  %v1435_v32 = vpack.c.bf16 %v262_v21, %v246_v18  ;;  %v3597_v18 = vld [vmem:[%s4770_s1 + $0x3d8] sm:$0xff] }
 0x127   : > { %v942_v37 = vadd.f32 %v941_v36, %v892_v35  ;;  %v1436_v36 = vpack.c.bf16 %v263_v23, %v247_v22  ;;  %2371 = vmatpush.bf16.msrb.mxu3 %v3597_v18 }
 0x128   : > { %v4303_v38 = vadd.f32 %v1037_v33, %v989_v34 }
 0x12d   : > { %v990_v51 = vpop.f32.mrf.mxu2  ;;  %v1243_v57 = vpop.f32.mrf.mxu0 }
 0x12e   : > { %v1039_v52 = vpop.f32.mrf.mxu3  ;;  %v991_v56 = vadd.f32 %v990_v51, %v942_v37  ;;  %v1292_v58 = vpop.f32.mrf.mxu1  ;;  %v1244_v0 = vadd.f32 %v1243_v57, %v4135_v63  ;;  %v293_v57 = vld [vmem:[%s3917_s10 + $0x2c0] sm:$0xff] }
 0x130   : > { %v4320_v1 = vadd.f32 %v1039_v52, %v991_v56  ;;  %v1293_v3 = vadd.f32 %v1292_v58, %v1244_v0  ;;  %1727 = vmatmul.bf16.vlgmr.msra.gmra.mxu0 %v1430_v53  ;;  %v3574_v52 = vld [vmem:[%s4770_s1 + $0x320] sm:$0xff]  ;;  %v278_v58 = vld [vmem:[%s3917_s10 + $0x248] sm:$0xff]  ;;  %v295_v0 = vld [vmem:[%s3917_s10 + $0x2d0] sm:$0xff] }
 0x131   : > { %1776 = vmatmul.bf16.vlgmr.msra.gmra.mxu1 %v1431_v55  ;;  %v3582_v53 = vld [vmem:[%s4770_s1 + $0x360] sm:$0xff]  ;;  %2223 = vmatpush.bf16.msrb.mxu0 %v3574_v52 }
 0x132   : > { %1825 = vmatmul.bf16.vlgmr.msra.gmra.mxu2 %v1432_v61  ;;  %v277_v56 = vld [vmem:[%s3917_s10 + $0x240] sm:$0xff]  ;;  %v294_v61 = vld [vmem:[%s3917_s10 + $0x2c8] sm:$0xff]  ;;  %2272 = vmatpush.bf16.msrb.mxu1 %v3582_v53 }
 0x133   : > { %1874 = vmatmul.bf16.vlgmr.msra.gmra.mxu3 %v1433_v62  ;;  %v279_v62 = vld [vmem:[%s3917_s10 + $0x250] sm:$0xff] }
 0x135   : > { %v1341_v63 = vpop.f32.mrf.mxu2  ;;  %v1245_v8 = vpop.f32.mrf.mxu0 }
 0x136   : > { %v1390_v6 = vpop.f32.mrf.mxu3  ;;  %v1342_v7 = vadd.f32 %v1341_v63, %v1293_v3  ;;  %v1294_v9 = vpop.f32.mrf.mxu1  ;;  %v1246_v10 = vadd.f32 %v1245_v8, %v4151_v20  ;;  %v248_v20 = vld [vmem:[%s3917_s10 + $0x158] sm:$0xff]  ;;  %v1438_v63 = vpack.c.bf16 %v293_v57, %v277_v56  ;;  %v3588_v57 = vld [vmem:[%s4770_s1 + $0x390] sm:$0xff] }
 0x137   : > { %v1437_v37 = vpack.c.bf16 %v264_v24, %v248_v20  ;;  %v296_v3 = vld [vmem:[%s3917_s10 + $0x2d8] sm:$0xff]  ;;  %2323 = vmatpush.bf16.msrb.mxu2 %v3588_v57 }
 0x138   : > { %v4329_v11 = vadd.f32 %v1390_v6, %v1342_v7  ;;  %v1295_v14 = vadd.f32 %v1294_v9, %v1246_v10  ;;  %v1439_v6 = vpack.c.bf16 %v294_v61, %v278_v58  ;;  %v1440_v10 = vpack.c.bf16 %v295_v0, %v279_v62  ;;  %v3596_v58 = vld [vmem:[%s4770_s1 + $0x3d0] sm:$0xff] }
 0x139   : > { %2372 = vmatpush.bf16.msrb.mxu3 %v3596_v58 }
 0x13d   : > { %v1343_v25 = vpop.f32.mrf.mxu2  ;;  %v1248_v34 = vpop.f32.mrf.mxu0 }
 0x13e   : > { %v1392_v28 = vpop.f32.mrf.mxu3  ;;  %v1344_v33 = vadd.f32 %v1343_v25, %v1295_v14  ;;  %v1297_v35 = vpop.f32.mrf.mxu1  ;;  %v1249_v39 = vadd.f32 %v1248_v34, %v4159_v29  ;;  %v325_v34 = vld [vmem:[%s3917_s10 + $0x3c0] sm:$0xff] }
 0x140   : > { %v4346_v40 = vadd.f32 %v1392_v28, %v1344_v33  ;;  %v1298_v41 = vadd.f32 %v1297_v35, %v1249_v39  ;;  %1732 = vmatmul.bf16.gmra.mxu0 %v1434_v30  ;;  %v3573_v28 = vld [vmem:[%s4770_s1 + $0x318] sm:$0xff]  ;;  %v309_v33 = vld [vmem:[%s3917_s10 + $0x340] sm:$0xff]  ;;  %v310_v35 = vld [vmem:[%s3917_s10 + $0x348] sm:$0xff] }
 0x141   : > { %1781 = vmatmul.bf16.gmra.mxu1 %v1435_v32  ;;  %v3581_v30 = vld [vmem:[%s4770_s1 + $0x358] sm:$0xff]  ;;  %2224 = vmatpush.bf16.msrb.mxu0 %v3573_v28  ;;  %v327_v39 = vld [vmem:[%s3917_s10 + $0x3d0] sm:$0xff] }
 0x142   : > { %1830 = vmatmul.bf16.gmra.mxu2 %v1436_v36  ;;  %v326_v36 = vld [vmem:[%s3917_s10 + $0x3c8] sm:$0xff]  ;;  %2273 = vmatpush.bf16.msrb.mxu1 %v3581_v30 }
 0x143   : > { %1879 = vmatmul.bf16.gmra.mxu3 %v1437_v37  ;;  %v311_v37 = vld [vmem:[%s3917_s10 + $0x350] sm:$0xff] }
 0x145   : > { %v1346_v29 = vpop.f32.mrf.mxu2  ;;  %v1250_v46 = vpop.f32.mrf.mxu0 }
 0x146   : > { %v1395_v44 = vpop.f32.mrf.mxu3  ;;  %v1347_v45 = vadd.f32 %v1346_v29, %v1298_v41  ;;  %v1299_v47 = vpop.f32.mrf.mxu1  ;;  %v1251_v48 = vadd.f32 %v1250_v46, %v4175_v50  ;;  %v280_v50 = vld [vmem:[%s3917_s10 + $0x258] sm:$0xff]  ;;  %v1442_v29 = vpack.c.bf16 %v325_v34, %v309_v33  ;;  %v3587_v34 = vld [vmem:[%s4770_s1 + $0x388] sm:$0xff] }
 0x147   : > { %v1441_v12 = vpack.c.bf16 %v296_v3, %v280_v50  ;;  %v328_v41 = vld [vmem:[%s3917_s10 + $0x3d8] sm:$0xff]  ;;  %2324 = vmatpush.bf16.msrb.mxu2 %v3587_v34 }
 0x148   : > { %v4355_v51 = vadd.f32 %v1395_v44, %v1347_v45  ;;  %v1300_v55 = vadd.f32 %v1299_v47, %v1251_v48  ;;  %v1443_v44 = vpack.c.bf16 %v326_v36, %v310_v35  ;;  %v1444_v48 = vpack.c.bf16 %v327_v39, %v311_v37  ;;  %v3595_v35 = vld [vmem:[%s4770_s1 + $0x3c8] sm:$0xff] }
 0x149   : > { %2373 = vmatpush.bf16.msrb.mxu3 %v3595_v35 }
 0x14d   : > { %v1348_v4 = vpop.f32.mrf.mxu2  ;;  %v1253_v8 = vpop.f32.mrf.mxu0 }
 0x14e   : > { %v1397_v5 = vpop.f32.mrf.mxu3  ;;  %v1349_v7 = vadd.f32 %v1348_v4, %v1300_v55  ;;  %v1302_v9 = vpop.f32.mrf.mxu1  ;;  %v1254_v13 = vadd.f32 %v1253_v8, %v4183_v59  ;;  %v357_v8 = vld [vmem:[%s3917_s10 + $0x4c0] sm:$0xff] }
 0x150   : > { %v4372_v14 = vadd.f32 %v1397_v5, %v1349_v7  ;;  %v1303_v15 = vadd.f32 %v1302_v9, %v1254_v13  ;;  %1737 = vmatmul.bf16.gmra.mxu0 %v1438_v63  ;;  %v3572_v5 = vld [vmem:[%s4770_s1 + $0x310] sm:$0xff]  ;;  %v341_v7 = vld [vmem:[%s3917_s10 + $0x440] sm:$0xff]  ;;  %v342_v9 = vld [vmem:[%s3917_s10 + $0x448] sm:$0xff] }
 0x151   : > { %1786 = vmatmul.bf16.gmra.mxu1 %v1439_v6  ;;  %v3580_v63 = vld [vmem:[%s4770_s1 + $0x350] sm:$0xff]  ;;  %2225 = vmatpush.bf16.msrb.mxu0 %v3572_v5 }
 0x152   : > { %1835 = vmatmul.bf16.gmra.mxu2 %v1440_v10  ;;  %v358_v10 = vld [vmem:[%s3917_s10 + $0x4c8] sm:$0xff]  ;;  %2274 = vmatpush.bf16.msrb.mxu1 %v3580_v63  ;;  %v359_v13 = vld [vmem:[%s3917_s10 + $0x4d0] sm:$0xff] }
 0x153   : > { %1884 = vmatmul.bf16.gmra.mxu3 %v1441_v12  ;;  %v343_v12 = vld [vmem:[%s3917_s10 + $0x450] sm:$0xff] }
 0x155   : > { %v1351_v59 = vpop.f32.mrf.mxu2  ;;  %v1255_v23 = vpop.f32.mrf.mxu0 }
 0x156   : > { %v1400_v21 = vpop.f32.mrf.mxu3  ;;  %v1352_v22 = vadd.f32 %v1351_v59, %v1303_v15  ;;  %v1304_v20 = vpop.f32.mrf.mxu1  ;;  %v1256_v24 = vadd.f32 %v1255_v23, %v4199_v17  ;;  %v312_v17 = vld [vmem:[%s3917_s10 + $0x358] sm:$0xff]  ;;  %v1446_v59 = vpack.c.bf16 %v357_v8, %v341_v7  ;;  %v3586_v8 = vld [vmem:[%s4770_s1 + $0x380] sm:$0xff] }
 0x157   : > { %v1445_v52 = vpack.c.bf16 %v328_v41, %v312_v17  ;;  %v360_v15 = vld [vmem:[%s3917_s10 + $0x4d8] sm:$0xff]  ;;  %2325 = vmatpush.bf16.msrb.mxu2 %v3586_v8 }
 0x158   : > { %v4381_v25 = vadd.f32 %v1400_v21, %v1352_v22  ;;  %v1305_v32 = vadd.f32 %v1304_v20, %v1256_v24  ;;  %v1447_v21 = vpack.c.bf16 %v358_v10, %v342_v9  ;;  %v1448_v24 = vpack.c.bf16 %v359_v13, %v343_v12  ;;  %v3594_v9 = vld [vmem:[%s4770_s1 + $0x3c0] sm:$0xff] }
 0x159   : > { %2374 = vmatpush.bf16.msrb.mxu3 %v3594_v9 }
 0x15d   : > { %v1353_v42 = vpop.f32.mrf.mxu2  ;;  %v1258_v46 = vpop.f32.mrf.mxu0 }
 0x15e   : > { %v1402_v43 = vpop.f32.mrf.mxu3  ;;  %v1354_v45 = vadd.f32 %v1353_v42, %v1305_v32  ;;  %v1307_v47 = vpop.f32.mrf.mxu1  ;;  %v1259_v53 = vadd.f32 %v1258_v46, %v4207_v27  ;;  %v389_v46 = vld [vmem:[%s3917_s10 + $0x5c0] sm:$0xff] }
 0x160   : > { %v4398_v55 = vadd.f32 %v1402_v43, %v1354_v45  ;;  %v1308_v56 = vadd.f32 %v1307_v47, %v1259_v53  ;;  %1742 = vmatmul.bf16.gmra.mxu0 %v1442_v29  ;;  %v3571_v43 = vld [vmem:[%s4770_s1 + $0x308] sm:$0xff]  ;;  %v373_v45 = vld [vmem:[%s3917_s10 + $0x540] sm:$0xff]  ;;  %v391_v53 = vld [vmem:[%s3917_s10 + $0x5d0] sm:$0xff] }
 0x161   : > { %1791 = vmatmul.bf16.gmra.mxu1 %v1443_v44  ;;  %v3579_v29 = vld [vmem:[%s4770_s1 + $0x348] sm:$0xff]  ;;  %2226 = vmatpush.bf16.msrb.mxu0 %v3571_v43 }
 0x162   : > { %1840 = vmatmul.bf16.gmra.mxu2 %v1444_v48  ;;  %v374_v47 = vld [vmem:[%s3917_s10 + $0x548] sm:$0xff]  ;;  %2275 = vmatpush.bf16.msrb.mxu1 %v3579_v29 }
 0x163   : > { %1889 = vmatmul.bf16.gmra.mxu3 %v1445_v52  ;;  %v390_v48 = vld [vmem:[%s3917_s10 + $0x5c8] sm:$0xff]  ;;  %v375_v52 = vld [vmem:[%s3917_s10 + $0x550] sm:$0xff] }
 0x165   : > { %v1356_v27 = vpop.f32.mrf.mxu2  ;;  %v1260_v0 = vpop.f32.mrf.mxu0 }
 0x166   : > { %v1405_v61 = vpop.f32.mrf.mxu3  ;;  %v1357_v62 = vadd.f32 %v1356_v27, %v1308_v56  ;;  %v1309_v50 = vpop.f32.mrf.mxu1  ;;  %v1261_v3 = vadd.f32 %v1260_v0, %v4223_v49  ;;  %v344_v49 = vld [vmem:[%s3917_s10 + $0x458] sm:$0xff]  ;;  %v1450_v27 = vpack.c.bf16 %v389_v46, %v373_v45 }
 0x167   : > { %v1449_v28 = vpack.c.bf16 %v360_v15, %v344_v49  ;;  %v392_v56 = vld [vmem:[%s3917_s10 + $0x5d8] sm:$0xff] }
 0x168   : > { %v4407_v4 = vadd.f32 %v1405_v61, %v1357_v62  ;;  %v1310_v6 = vadd.f32 %v1309_v50, %v1261_v3  ;;  %v1451_v61 = vpack.c.bf16 %v390_v48, %v374_v47  ;;  %v1452_v3 = vpack.c.bf16 %v391_v53, %v375_v52 }
 0x16d   : > { %v1358_v16 = vpop.f32.mrf.mxu2  ;;  %v1263_v23 = vpop.f32.mrf.mxu0 }
 0x16e   : > { %v1407_v18 = vpop.f32.mrf.mxu3  ;;  %v1359_v22 = vadd.f32 %v1358_v16, %v1310_v6  ;;  %v1312_v20 = vpop.f32.mrf.mxu1  ;;  %v1264_v30 = vadd.f32 %v1263_v23, %v4231_v60  ;;  %v421_v23 = vld [vmem:[%s3917_s10 + $0x6c0] sm:$0xff] }
 0x170   : > { %v4424_v32 = vadd.f32 %v1407_v18, %v1359_v22  ;;  %v1313_v33 = vadd.f32 %v1312_v20, %v1264_v30  ;;  %1747 = vmatmul.bf16.gmra.mxu0 %v1446_v59  ;;  %v3570_v18 = vld [vmem:[%s4770_s1 + $0x300] sm:$0xff]  ;;  %v406_v20 = vld [vmem:[%s3917_s10 + $0x648] sm:$0xff]  ;;  %v423_v30 = vld [vmem:[%s3917_s10 + $0x6d0] sm:$0xff] }
 0x171   : > { %1796 = vmatmul.bf16.gmra.mxu1 %v1447_v21  ;;  %v3578_v59 = vld [vmem:[%s4770_s1 + $0x340] sm:$0xff]  ;;  %2227 = vmatpush.bf16.msrb.mxu0 %v3570_v18 }
 0x172   : > { %1845 = vmatmul.bf16.gmra.mxu2 %v1448_v24  ;;  %v405_v22 = vld [vmem:[%s3917_s10 + $0x640] sm:$0xff]  ;;  %v422_v24 = vld [vmem:[%s3917_s10 + $0x6c8] sm:$0xff]  ;;  %2276 = vmatpush.bf16.msrb.mxu1 %v3578_v59 }
 0x173   : > { %1894 = vmatmul.bf16.gmra.mxu3 %v1449_v28  ;;  %v407_v28 = vld [vmem:[%s3917_s10 + $0x650] sm:$0xff] }
 0x175   : > { %v1361_v60 = vpop.f32.mrf.mxu2  ;;  %v1265_v39 = vpop.f32.mrf.mxu0 }
 0x176   : > { %v1410_v36 = vpop.f32.mrf.mxu3  ;;  %v1362_v37 = vadd.f32 %v1361_v60, %v1313_v33  ;;  %v1314_v17 = vpop.f32.mrf.mxu1  ;;  %v1266_v41 = vadd.f32 %v1265_v39, %v4247_v19  ;;  %v376_v19 = vld [vmem:[%s3917_s10 + $0x558] sm:$0xff]  ;;  %v1454_v60 = vpack.c.bf16 %v421_v23, %v405_v22 }
 0x177   : > { %v1453_v5 = vpack.c.bf16 %v392_v56, %v376_v19  ;;  %v424_v33 = vld [vmem:[%s3917_s10 + $0x6d8] sm:$0xff] }
 0x178   : > { %v4433_v42 = vadd.f32 %v1410_v36, %v1362_v37  ;;  %v1315_v44 = vadd.f32 %v1314_v17, %v1266_v41  ;;  %v1455_v36 = vpack.c.bf16 %v422_v24, %v406_v20  ;;  %v1456_v41 = vpack.c.bf16 %v423_v30, %v407_v28  ;;  %v217_v28 = vld [vmem:[%s3917_s10 + $0x60] sm:$0xff] }
 0x179   : > { %v233_v30 = vld [vmem:[%s3917_s10 + $0xe0] sm:$0xff] }
 0x17d   : > { %v1363_v57 = vpop.f32.mrf.mxu2  ;;  %v1268_v0 = vpop.f32.mrf.mxu0 }
 0x17e   : > { %v1412_v58 = vpop.f32.mrf.mxu3  ;;  %v1364_v62 = vadd.f32 %v1363_v57, %v1315_v44  ;;  %v1317_v50 = vpop.f32.mrf.mxu1  ;;  %v1269_v63 = vadd.f32 %v1268_v0, %v4255_v31  ;;  %v437_v57 = vld [vmem:[%s3917_s10 + $0x740] sm:$0xff]  ;;  %v455_v0 = vld [vmem:[%s3917_s10 + $0x7d0] sm:$0xff] }
 0x180   : > { %v4450_v6 = vadd.f32 %v1412_v58, %v1364_v62  ;;  %v1318_v7 = vadd.f32 %v1317_v50, %v1269_v63  ;;  %1752 = vmatmul.bf16.gmra.mxu0 %v1450_v27  ;;  %v453_v58 = vld [vmem:[%s3917_s10 + $0x7c0] sm:$0xff]  ;;  %v438_v27 = vld [vmem:[%s3917_s10 + $0x748] sm:$0xff]  ;;  %v439_v62 = vld [vmem:[%s3917_s10 + $0x750] sm:$0xff] }
 0x181   : > { %1801 = vmatmul.bf16.gmra.mxu1 %v1451_v61  ;;  %v454_v61 = vld [vmem:[%s3917_s10 + $0x7c8] sm:$0xff]  ;;  %v440_v50 = vld [vmem:[%s3917_s10 + $0x758] sm:$0xff] }
 0x182   : > { %1850 = vmatmul.bf16.gmra.mxu2 %v1452_v3  ;;  %v456_v3 = vld [vmem:[%s3917_s10 + $0x7d8] sm:$0xff]  ;;  %v1459_v8 = vpack.c.bf16 %v454_v61, %v438_v27  ;;  %v249_v61 = vld [vmem:[%s3917_s10 + $0x160] sm:$0xff] }
 0x183   : > { %1899 = vmatmul.bf16.gmra.mxu3 %v1453_v5 }
 0x185   : > { %v1366_v31 = vpop.f32.mrf.mxu2  ;;  %v1270_v13 = vpop.f32.mrf.mxu0 }
 0x186   : > { %v1415_v10 = vpop.f32.mrf.mxu3  ;;  %v1367_v12 = vadd.f32 %v1366_v31, %v1318_v7  ;;  %v1319_v49 = vpop.f32.mrf.mxu1  ;;  %v1271_v15 = vadd.f32 %v1270_v13, %v4271_v54  ;;  %v408_v54 = vld [vmem:[%s3917_s10 + $0x658] sm:$0xff]  ;;  %v1458_v7 = vpack.c.bf16 %v453_v58, %v437_v57 }
 0x187   : > { %v1457_v43 = vpack.c.bf16 %v424_v33, %v408_v54  ;;  %v218_v54 = vld [vmem:[%s3917_s10 + $0x68] sm:$0xff] }
 0x188   : > { %v4459_v16 = vadd.f32 %v1415_v10, %v1367_v12  ;;  %v1320_v21 = vadd.f32 %v1319_v49, %v1271_v15  ;;  %v1460_v12 = vpack.c.bf16 %v455_v0, %v439_v62  ;;  %v234_v33 = vld [vmem:[%s3917_s10 + $0xe8] sm:$0xff]  ;;  %v265_v62 = vld [vmem:[%s3917_s10 + $0x1e0] sm:$0xff] }
 0x18d   : > { %v1368_v34 = vpop.f32.mrf.mxu2  ;;  %v1273_v39 = vpop.f32.mrf.mxu0 }
 0x18e   : > { %v1417_v35 = vpop.f32.mrf.mxu3  ;;  %v1369_v37 = vadd.f32 %v1368_v34, %v1320_v21  ;;  %v1322_v17 = vpop.f32.mrf.mxu1  ;;  %v1274_v29 = vadd.f32 %v1273_v39, %v4279_v2  ;;  %v219_v34 = vld [vmem:[%s3917_s10 + $0x70] sm:$0xff] }
 0x190   : > { %v4476_v44 = vadd.f32 %v1417_v35, %v1369_v37  ;;  %v1323_v45 = vadd.f32 %v1322_v17, %v1274_v29  ;;  %1757 = vmatmul.bf16.gmra.mxu0 %v1454_v60  ;;  %v235_v35 = vld [vmem:[%s3917_s10 + $0xf0] sm:$0xff]  ;;  %v220_v60 = vld [vmem:[%s3917_s10 + $0x78] sm:$0xff]  ;;  %v1931_v17 = vpack.c.bf16 %v233_v30, %v217_v28 }
 0x191   : > { %1806 = vmatmul.bf16.gmra.mxu1 %v1455_v36  ;;  %v236_v36 = vld [vmem:[%s3917_s10 + $0xf8] sm:$0xff] }
 0x192   : > { %1855 = vmatmul.bf16.gmra.mxu2 %v1456_v41  ;;  %v1932_v41 = vpack.c.bf16 %v234_v33, %v218_v54 }
 0x193   : > { %1904 = vmatmul.bf16.gmra.mxu3 %v1457_v43 }
 0x195   : > { %v1371_v46 = vpop.f32.mrf.mxu2  ;;  %v1275_v52 = vpop.f32.mrf.mxu0 }
 0x196   : > { %v1420_v47 = vpop.f32.mrf.mxu3  ;;  %v1372_v48 = vadd.f32 %v1371_v46, %v1323_v45  ;;  %v1324_v53 = vpop.f32.mrf.mxu1  ;;  %v1276_v2 = vadd.f32 %v1275_v52, %v4295_v26  ;;  %v1461_v26 = vpack.c.bf16 %v456_v3, %v440_v50  ;;  %v1934_v46 = vpack.c.bf16 %v236_v36, %v220_v60  ;;  %v250_v50 = vld [vmem:[%s3917_s10 + $0x168] sm:$0xff] }
 0x197   : > { %v266_v3 = vld [vmem:[%s3917_s10 + $0x1e8] sm:$0xff] }
 0x198   : > { %v4479_v19 = vadd.f32 %v1420_v47, %v1372_v48  ;;  %v1325_v56 = vadd.f32 %v1324_v53, %v1276_v2  ;;  %v282_v36 = vld [vmem:[%s3917_s10 + $0x268] sm:$0xff] }
 0x19d   : > { %v1373_v5 = vpop.f32.mrf.mxu2  ;;  %v1278_v31 = vpop.f32.mrf.mxu0 }
 0x19e   : > { %v1422_v63 = vpop.f32.mrf.mxu3  ;;  %v1374_v9 = vadd.f32 %v1373_v5, %v1325_v56  ;;  %v1327_v10 = vpop.f32.mrf.mxu1  ;;  %v1279_v13 = vadd.f32 %v1278_v31, %v4303_v38  ;;  %v251_v5 = vld [vmem:[%s3917_s10 + $0x170] sm:$0xff] }
 0x1a0   : > { %v4490_v49 = vadd.f32 %v1422_v63, %v1374_v9  ;;  %v1328_v15 = vadd.f32 %v1327_v10, %v1279_v13  ;;  %1762 = vmatmul.bf16.gmra.mxu0 %v1458_v7  ;;  %v267_v63 = vld [vmem:[%s3917_s10 + $0x1f0] sm:$0xff]  ;;  %v252_v7 = vld [vmem:[%s3917_s10 + $0x178] sm:$0xff]  ;;  %v1935_v10 = vpack.c.bf16 %v265_v62, %v249_v61 }
 0x1a1   : > { %1811 = vmatmul.bf16.gmra.mxu1 %v1459_v8  ;;  %v268_v8 = vld [vmem:[%s3917_s10 + $0x1f8] sm:$0xff] }
 0x1a2   : > { %1860 = vmatmul.bf16.gmra.mxu2 %v1460_v12  ;;  %v1936_v12 = vpack.c.bf16 %v266_v3, %v250_v50 }
 0x1a3   : > { %1909 = vmatmul.bf16.gmra.mxu3 %v1461_v26 }
 0x1a5   : > { %v1376_v18 = vpop.f32.mrf.mxu2  ;;  %v1280_v22 = vpop.f32.mrf.mxu0 }
 0x1a6   : > { %v1425_v59 = vpop.f32.mrf.mxu3  ;;  %v1377_v21 = vadd.f32 %v1376_v18, %v1328_v15  ;;  %v1329_v23 = vpop.f32.mrf.mxu1  ;;  %v1281_v38 = vadd.f32 %v1280_v22, %v4320_v1  ;;  %v1933_v1 = vpack.c.bf16 %v235_v35, %v219_v34  ;;  %v1937_v18 = vpack.c.bf16 %v267_v63, %v251_v5  ;;  %v281_v34 = vld [vmem:[%s3917_s10 + $0x260] sm:$0xff] }
 0x1a7   : > { %v297_v35 = vld [vmem:[%s3917_s10 + $0x2e0] sm:$0xff] }
 0x1a8   : > { %v4493_v20 = vadd.f32 %v1425_v59, %v1377_v21  ;;  %v1330_v24 = vadd.f32 %v1329_v23, %v1281_v38  ;;  %v1938_v59 = vpack.c.bf16 %v268_v8, %v252_v7  ;;  %v313_v63 = vld [vmem:[%s3917_s10 + $0x360] sm:$0xff] }
 0x1a9   : > { %v329_v7 = vld [vmem:[%s3917_s10 + $0x3e0] sm:$0xff] }
 0x1ad   : > { %v1378_v37 = vpop.f32.mrf.mxu2  ;;  %v1728_v29 = vpop.f32.mrf.mxu0 }
 0x1ae   : > { %v1427_v39 = vpop.f32.mrf.mxu3  ;;  %v1379_v43 = vadd.f32 %v1378_v37, %v1330_v24  ;;  %v1777_v45 = vpop.f32.mrf.mxu1  ;;  %v283_v37 = vld [vmem:[%s3917_s10 + $0x270] sm:$0xff] }
 0x1af   : > { %v1778_v47 = vadd.f32 %v1777_v45, %v1728_v29  ;;  %v1939_v45 = vpack.c.bf16 %v297_v35, %v281_v34 }
 0x1b0   : > { %v4503_v48 = vadd.f32 %v1427_v39, %v1379_v43  ;;  %2228 = vmatmul.bf16.vlgmr.msrb.gmra.mxu0 %v1931_v17  ;;  %v299_v39 = vld [vmem:[%s3917_s10 + $0x2f0] sm:$0xff]  ;;  %v284_v17 = vld [vmem:[%s3917_s10 + $0x278] sm:$0xff] }
 0x1b1   : > { %2277 = vmatmul.bf16.vlgmr.msrb.gmra.mxu1 %v1932_v41  ;;  %v300_v41 = vld [vmem:[%s3917_s10 + $0x2f8] sm:$0xff] }
 0x1b2   : > { %2326 = vmatmul.bf16.vlgmr.msrb.gmra.mxu2 %v1933_v1 }
 0x1b3   : > { %2375 = vmatmul.bf16.vlgmr.msrb.gmra.mxu3 %v1934_v46 }
 0x1b5   : > { %v1826_v52 = vpop.f32.mrf.mxu2  ;;  %v1730_v56 = vpop.f32.mrf.mxu0 }
 0x1b6   : > { %v1875_v53 = vpop.f32.mrf.mxu3  ;;  %v1827_v2 = vadd.f32 %v1826_v52, %v1778_v47  ;;  %v1779_v57 = vpop.f32.mrf.mxu1 }
 0x1b7   : > { %v1780_v58 = vadd.f32 %v1779_v57, %v1730_v56 }
 0x1b8   : > { %v1876_v27 = vadd.f32 %v1875_v53, %v1827_v2  ;;  %v1941_v53 = vpack.c.bf16 %v299_v39, %v283_v37  ;;  %v1942_v2 = vpack.c.bf16 %v300_v41, %v284_v17  ;;  %v345_v39 = vld [vmem:[%s3917_s10 + $0x460] sm:$0xff] }
 0x1b9   : > { %v361_v17 = vld [vmem:[%s3917_s10 + $0x4e0] sm:$0xff] }
 0x1ba   : > { %v4508_v0 = vadd.f32 %v1876_v27, %v4329_v11 }
 0x1bd   : > { %v1828_v9 = vpop.f32.mrf.mxu2  ;;  %v1733_v13 = vpop.f32.mrf.mxu0 }
 0x1be   : > { %v1877_v31 = vpop.f32.mrf.mxu3  ;;  %v1829_v26 = vadd.f32 %v1828_v9, %v1780_v58  ;;  %v1782_v15 = vpop.f32.mrf.mxu1  ;;  %v314_v9 = vld [vmem:[%s3917_s10 + $0x368] sm:$0xff] }
 0x1bf   : > { %v1783_v21 = vadd.f32 %v1782_v15, %v1733_v13 }
 0x1c0   : > { %v1878_v11 = vadd.f32 %v1877_v31, %v1829_v26  ;;  %2233 = vmatmul.bf16.gmra.mxu0 %v1935_v10  ;;  %v315_v31 = vld [vmem:[%s3917_s10 + $0x370] sm:$0xff]  ;;  %v332_v26 = vld [vmem:[%s3917_s10 + $0x3f8] sm:$0xff] }
 0x1c1   : > { %2282 = vmatmul.bf16.gmra.mxu1 %v1936_v12  ;;  %v331_v10 = vld [vmem:[%s3917_s10 + $0x3f0] sm:$0xff]  ;;  %v316_v12 = vld [vmem:[%s3917_s10 + $0x378] sm:$0xff] }
 0x1c2   : > { %v4517_v22 = vadd.f32 %v1878_v11, %v4346_v40  ;;  %2331 = vmatmul.bf16.gmra.mxu2 %v1937_v18  ;;  %v298_v40 = vld [vmem:[%s3917_s10 + $0x2e8] sm:$0xff]  ;;  %v1943_v18 = vpack.c.bf16 %v329_v7, %v313_v63 }
 0x1c3   : > { %2380 = vmatmul.bf16.gmra.mxu3 %v1938_v59  ;;  %v1940_v1 = vpack.c.bf16 %v298_v40, %v282_v36 }
 0x1c5   : > { %v1831_v23 = vpop.f32.mrf.mxu2  ;;  %v1735_v28 = vpop.f32.mrf.mxu0 }
 0x1c6   : > { %v1880_v38 = vpop.f32.mrf.mxu3  ;;  %v1832_v24 = vadd.f32 %v1831_v23, %v1783_v21  ;;  %v1784_v30 = vpop.f32.mrf.mxu1 }
 0x1c7   : > { %v1785_v54 = vadd.f32 %v1784_v30, %v1735_v28 }
 0x1c8   : > { %v1881_v33 = vadd.f32 %v1880_v38, %v1832_v24  ;;  %v1945_v38 = vpack.c.bf16 %v331_v10, %v315_v31  ;;  %v1946_v24 = vpack.c.bf16 %v332_v26, %v316_v12  ;;  %v377_v10 = vld [vmem:[%s3917_s10 + $0x560] sm:$0xff] }
 0x1c9   : > { %v393_v12 = vld [vmem:[%s3917_s10 + $0x5e0] sm:$0xff] }
 0x1ca   : > { %v4522_v60 = vadd.f32 %v1881_v33, %v4355_v51 }
 0x1cd   : > { %v1833_v43 = vpop.f32.mrf.mxu2  ;;  %v1738_v47 = vpop.f32.mrf.mxu0 }
 0x1ce   : > { %v1882_v29 = vpop.f32.mrf.mxu3  ;;  %v1834_v46 = vadd.f32 %v1833_v43, %v1785_v54  ;;  %v1787_v52 = vpop.f32.mrf.mxu1  ;;  %v346_v43 = vld [vmem:[%s3917_s10 + $0x468] sm:$0xff] }
 0x1cf   : > { %v1788_v56 = vadd.f32 %v1787_v52, %v1738_v47 }
 0x1d0   : > { %v1883_v51 = vadd.f32 %v1882_v29, %v1834_v46  ;;  %2238 = vmatmul.bf16.gmra.mxu0 %v1939_v45  ;;  %v347_v29 = vld [vmem:[%s3917_s10 + $0x470] sm:$0xff]  ;;  %v364_v46 = vld [vmem:[%s3917_s10 + $0x4f8] sm:$0xff] }
 0x1d1   : > { %2287 = vmatmul.bf16.gmra.mxu1 %v1940_v1  ;;  %v363_v45 = vld [vmem:[%s3917_s10 + $0x4f0] sm:$0xff]  ;;  %v348_v1 = vld [vmem:[%s3917_s10 + $0x478] sm:$0xff] }
 0x1d2   : > { %v4531_v57 = vadd.f32 %v1883_v51, %v4372_v14  ;;  %2336 = vmatmul.bf16.gmra.mxu2 %v1941_v53  ;;  %v330_v14 = vld [vmem:[%s3917_s10 + $0x3e8] sm:$0xff]  ;;  %v1947_v53 = vpack.c.bf16 %v361_v17, %v345_v39 }
 0x1d3   : > { %2385 = vmatmul.bf16.gmra.mxu3 %v1942_v2  ;;  %v1944_v59 = vpack.c.bf16 %v330_v14, %v314_v9 }
 0x1d5   : > { %v1836_v58 = vpop.f32.mrf.mxu2  ;;  %v1740_v62 = vpop.f32.mrf.mxu0 }
 0x1d6   : > { %v1885_v27 = vpop.f32.mrf.mxu3  ;;  %v1837_v61 = vadd.f32 %v1836_v58, %v1788_v56  ;;  %v1789_v50 = vpop.f32.mrf.mxu1 }
 0x1d7   : > { %v1790_v3 = vadd.f32 %v1789_v50, %v1740_v62 }
 0x1d8   : > { %v1886_v5 = vadd.f32 %v1885_v27, %v1837_v61  ;;  %v1949_v27 = vpack.c.bf16 %v363_v45, %v347_v29  ;;  %v1950_v61 = vpack.c.bf16 %v364_v46, %v348_v1  ;;  %v409_v45 = vld [vmem:[%s3917_s10 + $0x660] sm:$0xff] }
 0x1d9   : > { %v425_v1 = vld [vmem:[%s3917_s10 + $0x6e0] sm:$0xff] }
 0x1da   : > { %v4536_v8 = vadd.f32 %v1886_v5, %v4381_v25 }
 0x1dd   : > { %v1838_v13 = vpop.f32.mrf.mxu2  ;;  %v1743_v11 = vpop.f32.mrf.mxu0 }
 0x1de   : > { %v1887_v15 = vpop.f32.mrf.mxu3  ;;  %v1839_v21 = vadd.f32 %v1838_v13, %v1790_v3  ;;  %v1792_v23 = vpop.f32.mrf.mxu1  ;;  %v378_v13 = vld [vmem:[%s3917_s10 + $0x568] sm:$0xff] }
 0x1df   : > { %v1793_v28 = vadd.f32 %v1792_v23, %v1743_v11 }
 0x1e0   : > { %v1888_v25 = vadd.f32 %v1887_v15, %v1839_v21  ;;  %2243 = vmatmul.bf16.gmra.mxu0 %v1943_v18  ;;  %v379_v15 = vld [vmem:[%s3917_s10 + $0x570] sm:$0xff]  ;;  %v396_v21 = vld [vmem:[%s3917_s10 + $0x5f8] sm:$0xff] }
 0x1e1   : > { %2292 = vmatmul.bf16.gmra.mxu1 %v1944_v59  ;;  %v395_v18 = vld [vmem:[%s3917_s10 + $0x5f0] sm:$0xff]  ;;  %v380_v59 = vld [vmem:[%s3917_s10 + $0x578] sm:$0xff] }
 0x1e2   : > { %v4545_v30 = vadd.f32 %v1888_v25, %v4398_v55  ;;  %2341 = vmatmul.bf16.gmra.mxu2 %v1945_v38  ;;  %v362_v55 = vld [vmem:[%s3917_s10 + $0x4e8] sm:$0xff]  ;;  %v1951_v38 = vpack.c.bf16 %v393_v12, %v377_v10 }
 0x1e3   : > { %2390 = vmatmul.bf16.gmra.mxu3 %v1946_v24  ;;  %v1948_v2 = vpack.c.bf16 %v362_v55, %v346_v43 }
 0x1e5   : > { %v1841_v54 = vpop.f32.mrf.mxu2  ;;  %v1745_v35 = vpop.f32.mrf.mxu0 }
 0x1e6   : > { %v1890_v33 = vpop.f32.mrf.mxu3  ;;  %v1842_v34 = vadd.f32 %v1841_v54, %v1793_v28  ;;  %v1794_v36 = vpop.f32.mrf.mxu1 }
 0x1e7   : > { %v1795_v40 = vadd.f32 %v1794_v36, %v1745_v35 }
 0x1e8   : > { %v1891_v37 = vadd.f32 %v1890_v33, %v1842_v34  ;;  %v1953_v33 = vpack.c.bf16 %v395_v18, %v379_v15  ;;  %v1954_v34 = vpack.c.bf16 %v396_v21, %v380_v59  ;;  %v441_v18 = vld [vmem:[%s3917_s10 + $0x760] sm:$0xff] }
 0x1e9   : > { %v457_v59 = vld [vmem:[%s3917_s10 + $0x7e0] sm:$0xff] }
 0x1ea   : > { %v4550_v41 = vadd.f32 %v1891_v37, %v4407_v4 }
 0x1ed   : > { %v1843_v47 = vpop.f32.mrf.mxu2  ;;  %v1748_v51 = vpop.f32.mrf.mxu0 }
 0x1ee   : > { %v1892_v52 = vpop.f32.mrf.mxu3  ;;  %v1844_v56 = vadd.f32 %v1843_v47, %v1795_v40  ;;  %v1797_v58 = vpop.f32.mrf.mxu1  ;;  %v410_v47 = vld [vmem:[%s3917_s10 + $0x668] sm:$0xff] }
 0x1ef   : > { %v1798_v62 = vadd.f32 %v1797_v58, %v1748_v51 }
 0x1f0   : > { %v1893_v4 = vadd.f32 %v1892_v52, %v1844_v56  ;;  %2248 = vmatmul.bf16.gmra.mxu0 %v1947_v53  ;;  %v411_v52 = vld [vmem:[%s3917_s10 + $0x670] sm:$0xff]  ;;  %v428_v56 = vld [vmem:[%s3917_s10 + $0x6f8] sm:$0xff] }
 0x1f1   : > { %2297 = vmatmul.bf16.gmra.mxu1 %v1948_v2  ;;  %v427_v53 = vld [vmem:[%s3917_s10 + $0x6f0] sm:$0xff]  ;;  %v412_v2 = vld [vmem:[%s3917_s10 + $0x678] sm:$0xff] }
 0x1f2   : > { %v4559_v50 = vadd.f32 %v1893_v4, %v4424_v32  ;;  %2346 = vmatmul.bf16.gmra.mxu2 %v1949_v27  ;;  %v394_v32 = vld [vmem:[%s3917_s10 + $0x5e8] sm:$0xff]  ;;  %v1955_v27 = vpack.c.bf16 %v425_v1, %v409_v45 }
 0x1f3   : > { %2395 = vmatmul.bf16.gmra.mxu3 %v1950_v61  ;;  %v1952_v24 = vpack.c.bf16 %v394_v32, %v378_v13 }
 0x1f5   : > { %v1846_v3 = vpop.f32.mrf.mxu2  ;;  %v1750_v7 = vpop.f32.mrf.mxu0 }
 0x1f6   : > { %v1895_v5 = vpop.f32.mrf.mxu3  ;;  %v1847_v63 = vadd.f32 %v1846_v3, %v1798_v62  ;;  %v1799_v9 = vpop.f32.mrf.mxu1 }
 0x1f7   : > { %v1800_v14 = vadd.f32 %v1799_v9, %v1750_v7 }
 0x1f8   : > { %v1896_v31 = vadd.f32 %v1895_v5, %v1847_v63  ;;  %v1957_v5 = vpack.c.bf16 %v427_v53, %v411_v52  ;;  %v1958_v63 = vpack.c.bf16 %v428_v56, %v412_v2 }
 0x1fa   : > { %v4564_v26 = vadd.f32 %v1896_v31, %v4433_v42 }
 0x1fd   : > { %v1848_v11 = vpop.f32.mrf.mxu2  ;;  %v1753_v25 = vpop.f32.mrf.mxu0 }
 0x1fe   : > { %v1897_v23 = vpop.f32.mrf.mxu3  ;;  %v1849_v28 = vadd.f32 %v1848_v11, %v1800_v14  ;;  %v1802_v54 = vpop.f32.mrf.mxu1  ;;  %v442_v11 = vld [vmem:[%s3917_s10 + $0x768] sm:$0xff] }
 0x1ff   : > { %v1803_v35 = vadd.f32 %v1802_v54, %v1753_v25 }
 0x200   : > { %v1898_v42 = vadd.f32 %v1897_v23, %v1849_v28  ;;  %2253 = vmatmul.bf16.gmra.mxu0 %v1951_v38  ;;  %v443_v23 = vld [vmem:[%s3917_s10 + $0x770] sm:$0xff]  ;;  %v460_v28 = vld [vmem:[%s3917_s10 + $0x7f8] sm:$0xff] }
 0x201   : > { %2302 = vmatmul.bf16.gmra.mxu1 %v1952_v24  ;;  %v459_v38 = vld [vmem:[%s3917_s10 + $0x7f0] sm:$0xff]  ;;  %v444_v24 = vld [vmem:[%s3917_s10 + $0x778] sm:$0xff] }
 0x202   : > { %v4573_v36 = vadd.f32 %v1898_v42, %v4450_v6  ;;  %2351 = vmatmul.bf16.gmra.mxu2 %v1953_v33  ;;  %v426_v6 = vld [vmem:[%s3917_s10 + $0x6e8] sm:$0xff]  ;;  %v1959_v33 = vpack.c.bf16 %v457_v59, %v441_v18 }
 0x203   : > { %2400 = vmatmul.bf16.gmra.mxu3 %v1954_v34  ;;  %v1956_v61 = vpack.c.bf16 %v426_v6, %v410_v47 }
 0x205   : > { %v1851_v40 = vpop.f32.mrf.mxu2  ;;  %v1755_v17 = vpop.f32.mrf.mxu0 }
 0x206   : > { %v1900_v37 = vpop.f32.mrf.mxu3  ;;  %v1852_v39 = vadd.f32 %v1851_v40, %v1803_v35  ;;  %v1804_v43 = vpop.f32.mrf.mxu1 }
 0x207   : > { %v1805_v55 = vadd.f32 %v1804_v43, %v1755_v17 }
 0x208   : > { %v1901_v29 = vadd.f32 %v1900_v37, %v1852_v39  ;;  %v1961_v37 = vpack.c.bf16 %v459_v38, %v443_v23  ;;  %v1962_v39 = vpack.c.bf16 %v460_v28, %v444_v24 }
 0x20a   : > { %v4578_v46 = vadd.f32 %v1901_v29, %v4459_v16 }
 0x20d   : > { %v1853_v51 = vpop.f32.mrf.mxu2  ;;  %v1758_v4 = vpop.f32.mrf.mxu0 }
 0x20e   : > { %v1902_v58 = vpop.f32.mrf.mxu3  ;;  %v1854_v62 = vadd.f32 %v1853_v51, %v1805_v55  ;;  %v1807_v3 = vpop.f32.mrf.mxu1 }
 0x20f   : > { %v1808_v7 = vadd.f32 %v1807_v3, %v1758_v4 }
 0x210   : > { %v1903_v16 = vadd.f32 %v1902_v58, %v1854_v62  ;;  %2258 = vmatmul.bf16.gmra.mxu0 %v1955_v27 }
 0x211   : > { %2307 = vmatmul.bf16.gmra.mxu1 %v1956_v61 }
 0x212   : > { %v4587_v9 = vadd.f32 %v1903_v16, %v4476_v44  ;;  %2356 = vmatmul.bf16.gmra.mxu2 %v1957_v5  ;;  %v458_v44 = vld [vmem:[%s3917_s10 + $0x7e8] sm:$0xff]  ;;  %s178_s10 = sand.u32 1, %s3740_s12   ;;  %s2476_s12 = ssub.s32 (%p3827_p4), 61, %s3868_s24 }
 0x213   : > { %2405 = vmatmul.bf16.gmra.mxu3 %v1958_v63  ;;  %v1960_v34 = vpack.c.bf16 %v458_v44, %v442_v11  ;;  %s2748_s5 = sshll.u32 %s178_s10, 7  ;;  %p2477_p8 = scmp.lt.s32.totalorder (%p3827_p4), %s2476_s12, 16 }
 0x214   : > { %s4617_s8 = scalar_lea.vmem [#allocation2], %s2748_s5  }
 0x215   : > { %v1856_v14 = vpop.f32.mrf.mxu2  ;;  %v1760_v12 = vpop.f32.mrf.mxu0 }
 0x216   : > { %v1905_v31 = vpop.f32.mrf.mxu3  ;;  %v1857_v10 = vadd.f32 %v1856_v14, %v1808_v7  ;;  %v1809_v13 = vpop.f32.mrf.mxu1 }
 0x217   : > { %v1810_v32 = vadd.f32 %v1809_v13, %v1760_v12 }
 0x218   : > { %v1906_v15 = vadd.f32 %v1905_v31, %v1857_v10 }
 0x21a   : > { %v4592_v21 = vadd.f32 %v1906_v15, %v4479_v19 }
 0x21d   : > { %v1858_v25 = vpop.f32.mrf.mxu2  ;;  %v1763_v42 = vpop.f32.mrf.mxu0 }
 0x21e   : > { %v1907_v54 = vpop.f32.mrf.mxu3  ;;  %v1859_v35 = vadd.f32 %v1858_v25, %v1810_v32  ;;  %v1812_v40 = vpop.f32.mrf.mxu1 }
 0x21f   : > { %v1813_v17 = vadd.f32 %v1812_v40, %v1763_v42 }
 0x220   : > { %v1908_v43 = vadd.f32 %v1907_v54, %v1859_v35  ;;  %2263 = vmatmul.bf16.gmra.mxu0 %v1959_v33 }
 0x221   : > { %2312 = vmatmul.bf16.gmra.mxu1 %v1960_v34 }
 0x222   : > { %v4601_v19 = vadd.f32 %v1908_v43, %v4490_v49  ;;  %2361 = vmatmul.bf16.gmra.mxu2 %v1961_v37 }
 0x223   : > { %2410 = vmatmul.bf16.gmra.mxu3 %v1962_v39 }
 0x225   : > { %v1861_v55 = vpop.f32.mrf.mxu2  ;;  %v1765_v1 = vpop.f32.mrf.mxu0 }
 0x226   : > { %v1910_v29 = vpop.f32.mrf.mxu3  ;;  %v1862_v45 = vadd.f32 %v1861_v55, %v1813_v17  ;;  %v1814_v47 = vpop.f32.mrf.mxu1 }
 0x227   : > { %v1815_v6 = vadd.f32 %v1814_v47, %v1765_v1 }
 0x228   : > { %v1911_v52 = vadd.f32 %v1910_v29, %v1862_v45 }
 0x22a   : > { %v4604_v53 = vadd.f32 %v1911_v52, %v4493_v20  ;;  %v4613_v20 = vld [vmem:[%s4771_s2] ss:$0 sm:$0xff] }
 0x22d   : > { %v1863_v2 = vpop.f32.mrf.mxu2  ;;  %v2229_v58 = vpop.f32.mrf.mxu0 }
 0x22e   : > { %v1912_v56 = vpop.f32.mrf.mxu3  ;;  %v1864_v51 = vadd.f32 %v1863_v2, %v1815_v6  ;;  %v2278_v27 = vpop.f32.mrf.mxu1 }
 0x22f   : > { %v2279_v62 = vadd.f32 %v2278_v27, %v2229_v58 }
 0x230   : > { %v1913_v49 = vadd.f32 %v1912_v56, %v1864_v51 }
 0x232   : > { %v4607_v61 = vadd.f32 %v1913_v49, %v4503_v48 }
 0x235   : > { %v2327_v4 = vpop.f32.mrf.mxu2  ;;  %v2231_v63 = vpop.f32.mrf.mxu0 }
 0x236   : > { %v2376_v3 = vpop.f32.mrf.mxu3  ;;  %v2328_v5 = vadd.f32 %v2327_v4, %v2279_v62  ;;  %v2280_v7 = vpop.f32.mrf.mxu1 }
 0x237   : > { %v2281_v48 = vadd.f32 %v2280_v7, %v2231_v63 }
 0x238   : > { %v2377_v16 = vadd.f32 %v2376_v3, %v2328_v5 }
 0x23a   : > { %v2416_v14 = vadd.f32 %v2377_v16, %v4508_v0 }
 0x23c   : > { %v2436_v31 = vadd.f32 %v4613_v20, %v2416_v14 }
 0x23d   : > { %v2329_v10 = vpop.f32.mrf.mxu2  ;;  %v2234_v32 = vpop.f32.mrf.mxu0 }
 0x23e   : > { %v2378_v12 = vpop.f32.mrf.mxu3  ;;  %2452 = vst [vmem:[%s4617_s8] sm:$0xff] %v2436_v31  ;;  %v2330_v13 = vadd.f32 %v2329_v10, %v2281_v48  ;;  %v2283_v15 = vpop.f32.mrf.mxu1 }
 0x23f   : > { %v2284_v11 = vadd.f32 %v2283_v15, %v2234_v32 }
 0x240   : > { %v2379_v18 = vadd.f32 %v2378_v12, %v2330_v13 }
 0x242   : > { %v2417_v59 = vadd.f32 %v2379_v18, %v4517_v22 }
 0x244   : > { %v2437_v0 = vadd.f32 %v4613_v20, %v2417_v59 }
 0x245   : > { %v2332_v44 = vpop.f32.mrf.mxu2  ;;  %v2236_v24 = vpop.f32.mrf.mxu0 }
 0x246   : > { %v2381_v23 = vpop.f32.mrf.mxu3  ;;  %2453 = vst [vmem:[%s4617_s8 + $0x8] sm:$0xff] %v2437_v0  ;;  %v2333_v38 = vadd.f32 %v2332_v44, %v2284_v11  ;;  %v2285_v28 = vpop.f32.mrf.mxu1 }
 0x247   : > { %v2286_v34 = vadd.f32 %v2285_v28, %v2236_v24 }
 0x248   : > { %v2382_v25 = vadd.f32 %v2381_v23, %v2333_v38 }
 0x24a   : > { %v2418_v54 = vadd.f32 %v2382_v25, %v4522_v60 }
 0x24c   : > { %v2438_v33 = vadd.f32 %v4613_v20, %v2418_v54 }
 0x24d   : > { %v2334_v35 = vpop.f32.mrf.mxu2  ;;  %v2239_v40 = vpop.f32.mrf.mxu0 }
 0x24e   : > { %v2383_v42 = vpop.f32.mrf.mxu3  ;;  %2454 = vst [vmem:[%s4617_s8 + $0x10] sm:$0xff] %v2438_v33  ;;  %v2335_v22 = vadd.f32 %v2334_v35, %v2286_v34  ;;  %v2288_v37 = vpop.f32.mrf.mxu1 }
 0x24f   : > { %v2289_v43 = vadd.f32 %v2288_v37, %v2239_v40 }
 0x250   : > { %v2384_v39 = vadd.f32 %v2383_v42, %v2335_v22 }
 0x252   : > { %v2419_v17 = vadd.f32 %v2384_v39, %v4531_v57 }
 0x254   : > { %v2439_v55 = vadd.f32 %v4613_v20, %v2419_v17 }
 0x255   : > { %v2337_v29 = vpop.f32.mrf.mxu2  ;;  %v2241_v1 = vpop.f32.mrf.mxu0 }
 0x256   : > { %v2386_v45 = vpop.f32.mrf.mxu3  ;;  %2455 = vst [vmem:[%s4617_s8 + $0x18] sm:$0xff] %v2439_v55  ;;  %v2338_v60 = vadd.f32 %v2337_v29, %v2289_v43  ;;  %v2290_v47 = vpop.f32.mrf.mxu1 }
 0x257   : > { %v2291_v56 = vadd.f32 %v2290_v47, %v2241_v1 }
 0x258   : > { %v2387_v6 = vadd.f32 %v2386_v45, %v2338_v60 }
 0x25a   : > { %v2420_v52 = vadd.f32 %v2387_v6, %v4536_v8 }
 0x25c   : > { %v2440_v2 = vadd.f32 %v4613_v20, %v2420_v52 }
 0x25d   : > { %v2339_v51 = vpop.f32.mrf.mxu2  ;;  %v2244_v27 = vpop.f32.mrf.mxu0 }
 0x25e   : > { %v2388_v58 = vpop.f32.mrf.mxu3  ;;  %2456 = vst [vmem:[%s4617_s8 + $0x20] sm:$0xff] %v2440_v2  ;;  %v2340_v57 = vadd.f32 %v2339_v51, %v2291_v56  ;;  %v2293_v49 = vpop.f32.mrf.mxu1 }
 0x25f   : > { %v2294_v3 = vadd.f32 %v2293_v49, %v2244_v27 }
 0x260   : > { %v2389_v62 = vadd.f32 %v2388_v58, %v2340_v57 }
 0x262   : > { %v2421_v4 = vadd.f32 %v2389_v62, %v4545_v30 }
 0x264   : > { %v2441_v5 = vadd.f32 %v4613_v20, %v2421_v4 }
 0x265   : > { %v2342_v63 = vpop.f32.mrf.mxu2  ;;  %v2246_v16 = vpop.f32.mrf.mxu0 }
 0x266   : > { %v2391_v7 = vpop.f32.mrf.mxu3  ;;  %2457 = vst [vmem:[%s4617_s8 + $0x28] sm:$0xff] %v2441_v5  ;;  %v2343_v8 = vadd.f32 %v2342_v63, %v2294_v3  ;;  %v2295_v14 = vpop.f32.mrf.mxu1 }
 0x267   : > { %v2296_v12 = vadd.f32 %v2295_v14, %v2246_v16 }
 0x268   : > { %v2392_v31 = vadd.f32 %v2391_v7, %v2343_v8 }
 0x26a   : > { %v2422_v48 = vadd.f32 %v2392_v31, %v4550_v41 }
 0x26c   : > { %v2442_v10 = vadd.f32 %v4613_v20, %v2422_v48 }
 0x26d   : > { %v2344_v13 = vpop.f32.mrf.mxu2  ;;  %v2249_v15 = vpop.f32.mrf.mxu0 }
 0x26e   : > { %v2393_v32 = vpop.f32.mrf.mxu3  ;;  %2458 = vst [vmem:[%s4617_s8 + $0x30] sm:$0xff] %v2442_v10  ;;  %v2345_v30 = vadd.f32 %v2344_v13, %v2296_v12  ;;  %v2298_v18 = vpop.f32.mrf.mxu1 }
 0x26f   : > { %v2299_v0 = vadd.f32 %v2298_v18, %v2249_v15 }
 0x270   : > { %v2394_v59 = vadd.f32 %v2393_v32, %v2345_v30 }
 0x272   : > { %v2423_v11 = vadd.f32 %v2394_v59, %v4559_v50 }
 0x274   : > { %v2443_v44 = vadd.f32 %v4613_v20, %v2423_v11 }
 0x275   : > { %v2347_v23 = vpop.f32.mrf.mxu2  ;;  %v2251_v24 = vpop.f32.mrf.mxu0 }
 0x276   : > { %v2396_v38 = vpop.f32.mrf.mxu3  ;;  %2459 = vst [vmem:[%s4617_s8 + $0x38] sm:$0xff] %v2443_v44  ;;  %v2348_v41 = vadd.f32 %v2347_v23, %v2299_v0  ;;  %v2300_v28 = vpop.f32.mrf.mxu1 }
 0x277   : > { %v2301_v34 = vadd.f32 %v2300_v28, %v2251_v24 }
 0x278   : > { %v2397_v25 = vadd.f32 %v2396_v38, %v2348_v41 }
 0x27a   : > { %v2424_v54 = vadd.f32 %v2397_v25, %v4564_v26 }
 0x27c   : > { %v2444_v33 = vadd.f32 %v4613_v20, %v2424_v54 }
 0x27d   : > { %v2349_v35 = vpop.f32.mrf.mxu2  ;;  %v2254_v22 = vpop.f32.mrf.mxu0 }
 0x27e   : > { %v2398_v42 = vpop.f32.mrf.mxu3  ;;  %2460 = vst [vmem:[%s4617_s8 + $0x40] sm:$0xff] %v2444_v33  ;;  %v2350_v50 = vadd.f32 %v2349_v35, %v2301_v34  ;;  %v2303_v40 = vpop.f32.mrf.mxu1 }
 0x27f   : > { %v2304_v17 = vadd.f32 %v2303_v40, %v2254_v22 }
 0x280   : > { %v2399_v37 = vadd.f32 %v2398_v42, %v2350_v50 }
 0x282   : > { %v2425_v39 = vadd.f32 %v2399_v37, %v4573_v36 }
 0x284   : > { %v2445_v43 = vadd.f32 %v4613_v20, %v2425_v39 }
 0x285   : > { %v2352_v55 = vpop.f32.mrf.mxu2  ;;  %v2256_v45 = vpop.f32.mrf.mxu0 }
 0x286   : > { %v2401_v29 = vpop.f32.mrf.mxu3  ;;  %2461 = vst [vmem:[%s4617_s8 + $0x48] sm:$0xff] %v2445_v43  ;;  %v2353_v26 = vadd.f32 %v2352_v55, %v2304_v17  ;;  %v2305_v60 = vpop.f32.mrf.mxu1 }
 0x287   : > { %v2306_v52 = vadd.f32 %v2305_v60, %v2256_v45 }
 0x288   : > { %v2402_v1 = vadd.f32 %v2401_v29, %v2353_v26 }
 0x28a   : > { %v2426_v47 = vadd.f32 %v2402_v1, %v4578_v46 }
 0x28c   : > { %v2446_v6 = vadd.f32 %v4613_v20, %v2426_v47 }
 0x28d   : > { %v2354_v2 = vpop.f32.mrf.mxu2  ;;  %v2259_v51 = vpop.f32.mrf.mxu0 }
 0x28e   : > { %v2403_v56 = vpop.f32.mrf.mxu3  ;;  %2462 = vst [vmem:[%s4617_s8 + $0x50] sm:$0xff] %v2446_v6  ;;  %v2355_v36 = vadd.f32 %v2354_v2, %v2306_v52  ;;  %v2308_v58 = vpop.f32.mrf.mxu1 }
 0x28f   : > { %v2309_v49 = vadd.f32 %v2308_v58, %v2259_v51 }
 0x290   : > { %v2404_v57 = vadd.f32 %v2403_v56, %v2355_v36 }
 0x292   : > { %v2427_v27 = vadd.f32 %v2404_v57, %v4587_v9 }
 0x294   : > { %v2447_v62 = vadd.f32 %v4613_v20, %v2427_v27 }
 0x295   : > { %v2357_v4 = vpop.f32.mrf.mxu2  ;;  %v2261_v5 = vpop.f32.mrf.mxu0 }
 0x296   : > { %v2406_v3 = vpop.f32.mrf.mxu3  ;;  %2463 = vst [vmem:[%s4617_s8 + $0x58] sm:$0xff] %v2447_v62  ;;  %v2358_v46 = vadd.f32 %v2357_v4, %v2309_v49  ;;  %v2310_v63 = vpop.f32.mrf.mxu1 }
 0x297   : > { %v2311_v14 = vadd.f32 %v2310_v63, %v2261_v5 }
 0x298   : > { %v2407_v7 = vadd.f32 %v2406_v3, %v2358_v46 }
 0x29a   : > { %v2428_v8 = vadd.f32 %v2407_v7, %v4592_v21 }
 0x29c   : > { %v2448_v16 = vadd.f32 %v4613_v20, %v2428_v8 }
 0x29d   : > { %v2359_v31 = vpop.f32.mrf.mxu2  ;;  %v2264_v10 = vpop.f32.mrf.mxu0 }
 0x29e   : > { %v2408_v48 = vpop.f32.mrf.mxu3  ;;  %2464 = vst [vmem:[%s4617_s8 + $0x60] sm:$0xff] %v2448_v16  ;;  %v2360_v9 = vadd.f32 %v2359_v31, %v2311_v14  ;;  %v2313_v12 = vpop.f32.mrf.mxu1 }
 0x29f   : > { %v2314_v30 = vadd.f32 %v2313_v12, %v2264_v10 }
 0x2a0   : > { %v2409_v13 = vadd.f32 %v2408_v48, %v2360_v9 }
 0x2a2   : > { %v2429_v32 = vadd.f32 %v2409_v13, %v4601_v19 }
 0x2a4   : > { %v2449_v15 = vadd.f32 %v4613_v20, %v2429_v32 }
 0x2a5   : > { %v2362_v18 = vpop.f32.mrf.mxu2  ;;  %v2266_v0 = vpop.f32.mrf.mxu0 }
 0x2a6   : > { %v2411_v59 = vpop.f32.mrf.mxu3  ;;  %2465 = vst [vmem:[%s4617_s8 + $0x68] sm:$0xff] %v2449_v15  ;;  %v2363_v21 = vadd.f32 %v2362_v18, %v2314_v30  ;;  %v2315_v44 = vpop.f32.mrf.mxu1 }
 0x2a7   : > { %v2316_v41 = vadd.f32 %v2315_v44, %v2266_v0 }
 0x2a8   : > { %v2412_v11 = vadd.f32 %v2411_v59, %v2363_v21 }
 0x2aa   : > { %v2430_v23 = vadd.f32 %v2412_v11, %v4604_v53 }
 0x2ac   : > { %v2450_v38 = vadd.f32 %v4613_v20, %v2430_v23 }
 0x2ad   : > { %v2364_v24 = vpop.f32.mrf.mxu2 }
 0x2ae   : > { %2466 = vst [vmem:[%s4617_s8 + $0x70] sm:$0xff] %v2450_v38  ;;  %v2365_v28 = vadd.f32 %v2364_v24, %v2316_v41  ;;  %v2413_v19 = vpop.f32.mrf.mxu3 }
 0x2b0   : > { %v2414_v25 = vadd.f32 %v2413_v19, %v2365_v28 }
 0x2b2   : > { %v2431_v54 = vadd.f32 %v2414_v25, %v4607_v61  ;;  %2474 = sbr.rel (!%p3827_p4) target bundleno = 743 (0x2e7), region = 36 }
 0x2b4   : > { %v2451_v33 = vadd.f32 %v4613_v20, %v2431_v54 }
 0x2b6   : > { %2467 = vst [vmem:[%s4617_s8 + $0x78] sm:$0xff] %v2451_v33 }
 0x2b7   : > { %s4783_s12 = smov (!%p2477_p8, %s2476_s12), 16 }
 0x2b8   : > { %s3458_s18 = sshll.u32 %s4783_s12, 3 }
 0x2b9   : > { %p3461_p9 = scmp.eq.s32.totalorder %s3458_s18, 0 }
 0x2ba   : > { %s4678_s21 = sshrl.u32 (!%p3461_p9), %s4783_s12, 4 }
 0x2bb   : > { %2485 = sbr.rel (%p3461_p9) target bundleno = 743 (0x2e7), region = 40  ;;  %p3462_p10 = scmp.le.s32.totalorder (!%p3461_p9), %s4678_s21, 0 }
 0x2c0   : > { %2700 = sbr.rel (%p3462_p10) target bundleno = 726 (0x2d6), region = 119  ;;  %s4774_s15 = smov (!%p3462_p10), %s4672_s17 }
 0x2c1   : > { %s4775_s20 = smov (!%p3462_p10), %s4617_s8  ;;  %s4687_s24 = smov (!%p3462_p10), 0  }
 0x2c2   : > { %s4689_s22 = smov (!%p3462_p10), 0  }
 0x2c5 LB: >> { %v2578_v53 = vld [vmem:[%s3756_s20] sm:$0xff]  ;;  %v2580_v61 = vld [vmem:[%s3756_s20 + $0x8] sm:$0xff]  ;;  %v2582_v20 = vld [vmem:[%s3756_s20 + $0x10] sm:$0xff]  ;;  %s2610_s23 = sadd.s32 1, %s3760_s24  ;;  %s2572_s22 = sadd.s32 1, %s3764_s22   ;;  %s3764_s22 = sphi %s4689_s22, %s2572_s22   ;;  %s3760_s24 = sphi %s4687_s24, %s4778_s24   ;;  %s3756_s20 = sphi %s4775_s20, %s4777_s20   ;;  %s3752_s15 = sphi %s4774_s15, %s4776_s15  }
 0x2c6   : >> { %2579 = vst [vmem:[%s3752_s15] sm:$0xff] %v2578_v53  ;;  %v2584_v34 = vld [vmem:[%s3756_s20 + $0x18] sm:$0xff]  ;;  %p2611_p11 = scmp.ge.s32.totalorder %s2610_s23, %s4678_s21  ;;  %v2586_v35 = vld [vmem:[%s3756_s20 + $0x20] sm:$0xff]  ;;  %v2588_v42 = vld [vmem:[%s3756_s20 + $0x28] sm:$0xff]  ;;  %p2571_p12 = scmp.ge.s32.totalorder %s2572_s22, %s4678_s21 }
 0x2c7   : >> { %2581 = vst [vmem:[%s3752_s15 + $0x8] sm:$0xff] %v2580_v61  ;;  %v2590_v50 = vld [vmem:[%s3756_s20 + $0x30] sm:$0xff]  ;;  %v2592_v22 = vld [vmem:[%s3756_s20 + $0x38] sm:$0xff]  ;;  %v2594_v40 = vld [vmem:[%s3756_s20 + $0x40] sm:$0xff] }
 0x2c8   : >> { %2583 = vst [vmem:[%s3752_s15 + $0x10] sm:$0xff] %v2582_v20  ;;  %s4785_s23 = smov (%p2611_p11, %s2610_s23), 0  ;;  %v2596_v37 = vld [vmem:[%s3756_s20 + $0x48] sm:$0xff]  ;;  %v2598_v39 = vld [vmem:[%s3756_s20 + $0x50] sm:$0xff]  ;;  %v2600_v17 = vld [vmem:[%s3756_s20 + $0x58] sm:$0xff] }
 0x2c9   : >> { %2585 = vst [vmem:[%s3752_s15 + $0x18] sm:$0xff] %v2584_v34  ;;  %s3463_s25 = sshll.u32 %s4785_s23, 7  ;;  %v2602_v43 = vld [vmem:[%s3756_s20 + $0x60] sm:$0xff]  ;;  %v2604_v55 = vld [vmem:[%s3756_s20 + $0x68] sm:$0xff]  ;;  %v2606_v29 = vld [vmem:[%s3756_s20 + $0x70] sm:$0xff]  ;;  %s4778_s24 = smov %s4785_s23 }
 0x2ca   : >> { %2587 = vst [vmem:[%s3752_s15 + $0x20] sm:$0xff] %v2586_v35  ;;  %s2615_s26 = scalar_lea.vmem %s4617_s8, %s3463_s25 [#allocation2]   ;;  %s2616_s27 = scalar_lea.vmem %s4672_s17, %s3463_s25   ;;  %v2608_v26 = vld [vmem:[%s3756_s20 + $0x78] sm:$0xff] }
 0x2cb   : >> { %2589 = vst [vmem:[%s3752_s15 + $0x28] sm:$0xff] %v2588_v42  ;;  %s4777_s20 = smov %s2615_s26 }
 0x2cc   : >> { %2591 = vst [vmem:[%s3752_s15 + $0x30] sm:$0xff] %v2590_v50 }
 0x2cd   : >> { %2593 = vst [vmem:[%s3752_s15 + $0x38] sm:$0xff] %v2592_v22 }
 0x2ce   : >> { %2595 = vst [vmem:[%s3752_s15 + $0x40] sm:$0xff] %v2594_v40 }
 0x2cf   : >> { %2597 = vst [vmem:[%s3752_s15 + $0x48] sm:$0xff] %v2596_v37 }
 0x2d0   : >> { %2599 = vst [vmem:[%s3752_s15 + $0x50] sm:$0xff] %v2598_v39 }
 0x2d1   : >> { %2601 = vst [vmem:[%s3752_s15 + $0x58] sm:$0xff] %v2600_v17  ;;  %2574 = sbr.rel (!%p2571_p12) target bundleno = 709 (0x2c5), region = 125 }
 0x2d2   : >> { %2603 = vst [vmem:[%s3752_s15 + $0x60] sm:$0xff] %v2602_v43 }
 0x2d3   : >> { %2605 = vst [vmem:[%s3752_s15 + $0x68] sm:$0xff] %v2604_v55 }
 0x2d4   : >> { %2607 = vst [vmem:[%s3752_s15 + $0x70] sm:$0xff] %v2606_v29 }
 0x2d5   : >> { %2609 = vst [vmem:[%s3752_s15 + $0x78] sm:$0xff] %v2608_v26  ;;  %s4776_s15 = smov %s2616_s27 }
 0x2d6 PF: > { %s4751_s28 = sand.u32 15, %s4783_s12   ;;  %s3603_s29 = sshll.u32 %s4678_s21, 7 }
 0x2d7   : > { %s2621_s30 = scalar_lea.vmem %s4617_s8, %s3603_s29 [#allocation2]   ;;  %s2623_s4 = scalar_lea.vmem %s4672_s17, %s3603_s29  }
 0x2d8   : > { %p3468_p13 = scmp.le.s32.totalorder %s4751_s28, 0 }
 0x2d9   : > { %s3766_s10 = smov (!%p3468_p13), %s2623_s4   ;;  %s3770_s5 = smov (!%p3468_p13), %s2621_s30  }
 0x2da   : > { %2714 = sbr.rel (%p3468_p13) target bundleno = 743 (0x2e7), region = 130  ;;  %s3774_s6 = smov (!%p3468_p13), 0  }
 0x2db   : > { %s3778_s7 = smov (!%p3468_p13), 0  }
 0x2df LB: >> { %v2633_v45 = vld [vmem:[%s3772_s5] sm:$0xff]  ;;  %s2635_s12 = sadd.s32 1, %s3776_s6  ;;  %s2627_s7 = sadd.s32 1, %s3780_s7   ;;  %s3780_s7 = sphi %s3778_s7, %s2627_s7   ;;  %s3776_s6 = sphi %s3774_s6, %s3775_s6   ;;  %s3772_s5 = sphi %s3770_s5, %s2640_s5   ;;  %s3768_s10 = sphi %s3766_s10, %s2641_s10  }
 0x2e0   : >> { %2634 = vst [vmem:[%s3768_s10] sm:$0xff] %v2633_v45  ;;  %p2636_p0 = scmp.ge.s32.totalorder %s2635_s12, %s4751_s28  ;;  %p2626_p1 = scmp.ge.s32.totalorder %s2627_s7, %s4751_s28 }
 0x2e2   : >> { %s4787_s12 = smov (%p2636_p0, %s2635_s12), 0  ;;  %2629 = sbr.rel (!%p2626_p1) target bundleno = 735 (0x2df), region = 136 }
 0x2e3   : >> { %s3469_s8 = sshll.u32 %s4787_s12, 3  ;;  %s3775_s6 = smov %s4787_s12  }
 0x2e4   : >> { %s2640_s5 = scalar_lea.vmem %s2621_s30, %s3469_s8 [#allocation2]   ;;  %s2641_s10 = scalar_lea.vmem %s2623_s4, %s3469_s8  }
 0x2e7 PF: > { %p10_p2 = scmp.ge.s32.totalorder %s3817_s16, 6   ;;  %s4779_s12 = smov %s3744_s13 }
 0x2e8   : > { %s4780_s13 = smov %s3825_s19  ;;  %s4781_s14 = smov %s3817_s16 }
 0x2e9   :  { %12 = sbr.rel (!%p10_p2) target bundleno = 2 (0x2), region = 147 }

</bundles_post_ra>
